<compile_context>
chip_gen: v6e
topology: v6e:2x2x1
jax: 0.10.0
libtpu: 0.0.40
codegen_flags: <defaults>
</compile_context>

<pallas_src>
import math

import jax
import jax.numpy as jnp
from jax.experimental import pallas as pl
from jax.experimental.pallas import tpu as pltpu

BN_EPS = 1e-5
NUM_LAYERS = 5
D_PAD = 128   # lane-dense hidden/feature width inside the kernel
C_PAD = 128   # lane-dense class width inside the kernel


# ---------------------------------------------------------------------------
# Fused Pallas kernel: 5 x (GINConv -> ReLU -> BN) + pool + fc1 + ReLU + fc2
#                      + log_softmax
# ---------------------------------------------------------------------------
def make_fused_kernel(num_layers, num_classes):
    def kernel(a_ref, x_ref, p_ref,
               w1_ref, b1_ref, w2_ref, b2_ref, gamma_ref, beta_ref,
               fc1w_ref, fc1b_ref, fc2w_ref, fc2b_ref, out_ref):
        a = a_ref[...]                       # [N, N]      bf16 (exact counts)
        h = x_ref[...]                       # [N, D_PAD]  f32
        inv_n = 1.0 / h.shape[0]

        for i in range(num_layers):          # statically unrolled: weights stay in VMEM
            # GINConv (eps = 0): (1 + eps) * x + sum_{j in N(i)} x_j
            agg = jnp.dot(a, h.astype(jnp.bfloat16),
                          preferred_element_type=jnp.float32)
            z = h + agg
            # MLP: Linear -> ReLU -> Linear (bf16 operands, f32 accumulate)
            z = jnp.dot(z.astype(jnp.bfloat16), w1_ref[i],
                        preferred_element_type=jnp.float32) + b1_ref[i]
            z = jnp.maximum(z, 0.0)
            z = jnp.dot(z.astype(jnp.bfloat16), w2_ref[i],
                        preferred_element_type=jnp.float32) + b2_ref[i]
            # outer F.relu
            z = jnp.maximum(z, 0.0)
            # BatchNorm1d (training mode -> biased batch stats), single pass
            mean = jnp.sum(z, axis=0, keepdims=True) * inv_n
            msq = jnp.sum(z * z, axis=0, keepdims=True) * inv_n
            var = jnp.maximum(msq - mean * mean, 0.0)
            h = (gamma_ref[i] * (z - mean) * jax.lax.rsqrt(var + BN_EPS)
                 + beta_ref[i])

        # readout head: global_mean_pool + fc1 + ReLU + fc2 + log_softmax
        pooled = jnp.dot(p_ref[...], h, preferred_element_type=jnp.float32)
        t = jnp.dot(pooled, fc1w_ref[...],
                    preferred_element_type=jnp.float32) + fc1b_ref[...]
        t = jnp.maximum(t, 0.0)
        logits = jnp.dot(t, fc2w_ref[...],
                         preferred_element_type=jnp.float32) + fc2b_ref[...]
        # masked log_softmax over the real classes (class dim padded to C_PAD)
        col = jax.lax.broadcasted_iota(jnp.int32, logits.shape, 1)
        valid = col < num_classes
        lm = jnp.where(valid, logits, jnp.full_like(logits, -1e30))
        m = jnp.max(lm, axis=-1, keepdims=True)
        e = jnp.where(valid, jnp.exp(lm - m), 0.0)
        lse = m + jnp.log(jnp.sum(e, axis=-1, keepdims=True))
        out_ref[...] = lm - lse

    return kernel


# ---------------------------------------------------------------------------
# pallas_call wrapper (whole-array VMEM blocks; single fused launch)
# ---------------------------------------------------------------------------
def gin_forward(params, x, edge_index, batch, num_graphs):
    n = x.shape[0]
    num_classes = params["num_classes"]

    # dense adjacency: A[dst, src] += 1 per edge (message flow src -> dst)
    # bf16 is exact for small integer multiplicities.
    src, dst = edge_index[0], edge_index[1]
    a = (jnp.zeros((n, n), jnp.float32).at[dst, src].add(1.0)
         ).astype(jnp.bfloat16)

    # pooling matrix for global_mean_pool: P[g, n] = 1/|graph g| if batch[n]==g
    onehot = jax.nn.one_hot(batch, num_graphs, dtype=jnp.float32)       # [N, G]
    counts = jnp.maximum(jnp.sum(onehot, axis=0, keepdims=True), 1.0)   # [1, G]
    p = (onehot / counts).T                                             # [G, N]

    # lane-dense (128) feature padding for the first layer
    h0 = jnp.pad(x.astype(jnp.float32), ((0, 0), (0, D_PAD - x.shape[1])))

    args = (a, h0, p,
            params["w1"], params["b1"], params["w2"], params["b2"],
            params["gamma"], params["beta"],
            params["fc1_w"], params["fc1_b"], params["fc2_w"], params["fc2_b"])

    total_bytes = sum(int(v.size) * v.dtype.itemsize for v in args)
    vmem_limit = int(min(2 * total_bytes + (8 << 20), 64 << 20))

    out_padded = pl.pallas_call(
        make_fused_kernel(NUM_LAYERS, num_classes),
        out_shape=jax.ShapeDtypeStruct((num_graphs, C_PAD), jnp.float32),
        in_specs=[pl.BlockSpec(memory_space=pltpu.MemorySpace.VMEM)
                  for _ in range(len(args))],
        out_specs=pl.BlockSpec(memory_space=pltpu.MemorySpace.VMEM),
        compiler_params=pltpu.CompilerParams(vmem_limit_bytes=vmem_limit),
    )(*args)

    return out_padded[:, :num_classes]


# ---------------------------------------------------------------------------
# Parameter init (deterministic, PyTorch Linear-style uniform init), padded to
# lane-dense 128-wide weights/biases.
# ---------------------------------------------------------------------------
def init_linear(key, fan_in, fan_out, pad_in, pad_out):
    kw, kb = jax.random.split(key)
    bound = 1.0 / math.sqrt(fan_in)
    w = jax.random.uniform(kw, (fan_in, fan_out), jnp.float32, -bound, bound)
    b = jax.random.uniform(kb, (fan_out,), jnp.float32, -bound, bound)
    w = jnp.pad(w, ((0, pad_in - fan_in), (0, pad_out - fan_out)))
    b = jnp.pad(b, (0, pad_out - fan_out))[None, :]
    return w, b


def init_gin_params(key, num_features, num_classes, dim):
    keys = jax.random.split(key, 2 * NUM_LAYERS + 2)
    w1s, b1s, w2s, b2s, gammas, betas = [], [], [], [], [], []
    in_dim = num_features
    for i in range(NUM_LAYERS):
        w1, b1 = init_linear(keys[2 * i], in_dim, dim, D_PAD, D_PAD)
        w2, b2 = init_linear(keys[2 * i + 1], dim, dim, D_PAD, D_PAD)
        w1s.append(w1.astype(jnp.bfloat16))
        w2s.append(w2.astype(jnp.bfloat16))
        b1s.append(b1)
        b2s.append(b2)
        gammas.append(jnp.ones((1, D_PAD), jnp.float32))    # BN weight = 1
        betas.append(jnp.zeros((1, D_PAD), jnp.float32))    # BN bias = 0
        in_dim = dim
    fc1_w, fc1_b = init_linear(keys[-2], dim, dim, D_PAD, D_PAD)
    fc2_w, fc2_b = init_linear(keys[-1], dim, num_classes, D_PAD, C_PAD)
    return dict(
        w1=jnp.stack(w1s), b1=jnp.stack(b1s),          # [5,128,128] bf16, [5,1,128] f32
        w2=jnp.stack(w2s), b2=jnp.stack(b2s),
        gamma=jnp.stack(gammas), beta=jnp.stack(betas),
        fc1_w=fc1_w, fc1_b=fc1_b, fc2_w=fc2_w, fc2_b=fc2_b,
        num_classes=num_classes,
    )


# ---------------------------------------------------------------------------
if __name__ == "__main__":
    key = jax.random.PRNGKey(0)
    k_x, k_e, k_p = jax.random.split(key, 3)

    # small synthetic graph batch (module defaults: 1 feature, 1 class, dim 32)
    N, E, G = 64, 256, 2
    num_features, num_classes, dim = 1, 1, 32

    x = jax.random.normal(k_x, (N, num_features), jnp.float32)
    edge_index = jax.random.randint(k_e, (2, E), 0, N, jnp.int32)
    batch = jnp.repeat(jnp.arange(G, dtype=jnp.int32), N // G)

    params = init_gin_params(k_p, num_features, num_classes, dim)

    out = gin_forward(params, x, edge_index, batch, G)
    out = jax.block_until_ready(out)
    assert out.shape == (G, num_classes)
    assert bool(jnp.all(jnp.isfinite(out)))
    print("KERNEL_OK")
</pallas_src>

<mosaic_0001>
module attributes {stable_mosaic.version = 11 : i64} {
  func.func @kernel(%arg0: memref<64x64xbf16, #tpu.memory_space<vmem>>, %arg1: memref<64x128xf32, #tpu.memory_space<vmem>>, %arg2: memref<2x64xf32, #tpu.memory_space<vmem>>, %arg3: memref<5x128x128xbf16, #tpu.memory_space<vmem>>, %arg4: memref<5x1x128xf32, #tpu.memory_space<vmem>>, %arg5: memref<5x128x128xbf16, #tpu.memory_space<vmem>>, %arg6: memref<5x1x128xf32, #tpu.memory_space<vmem>>, %arg7: memref<5x1x128xf32, #tpu.memory_space<vmem>>, %arg8: memref<5x1x128xf32, #tpu.memory_space<vmem>>, %arg9: memref<128x128xf32, #tpu.memory_space<vmem>>, %arg10: memref<1x128xf32, #tpu.memory_space<vmem>>, %arg11: memref<128x128xf32, #tpu.memory_space<vmem>>, %arg12: memref<1x128xf32, #tpu.memory_space<vmem>>, %arg13: memref<2x128xf32, #tpu.memory_space<vmem>>) attributes {dimension_semantics = [], scalar_prefetch = 0 : i64, scratch_operands = 0 : i64, tpu.core_type = #tpu.core_type<tc>} {
    %c0 = arith.constant 0 : index
    %c0_0 = arith.constant 0 : index
    %0 = vector.load %arg0[%c0, %c0_0] : memref<64x64xbf16, #tpu.memory_space<vmem>>, vector<64x64xbf16>
    %c0_1 = arith.constant 0 : index
    %c0_2 = arith.constant 0 : index
    %1 = vector.load %arg1[%c0_1, %c0_2] : memref<64x128xf32, #tpu.memory_space<vmem>>, vector<64x128xf32>
    %2 = arith.truncf %1 : vector<64x128xf32> to vector<64x128xbf16>
    %cst = arith.constant dense<0.000000e+00> : vector<64x128xf32>
    %3 = tpu.matmul %0, %2, %cst {dimension_numbers = #tpu.dot_dimension_numbers<[1], [0], [0], [1], [0, 0, 1, 1], [], []>} : vector<64x64xbf16>, vector<64x128xbf16>, vector<64x128xf32> -> vector<64x128xf32>
    %4 = arith.addf %1, %3 : vector<64x128xf32>
    %5 = arith.truncf %4 : vector<64x128xf32> to vector<64x128xbf16>
    %c0_3 = arith.constant 0 : index
    %c0_4 = arith.constant 0 : index
    %c0_5 = arith.constant 0 : index
    %6 = vector.load %arg3[%c0_3, %c0_4, %c0_5] : memref<5x128x128xbf16, #tpu.memory_space<vmem>>, vector<1x128x128xbf16>
    %7 = vector.shape_cast %6 : vector<1x128x128xbf16> to vector<128x128xbf16>
    %cst_6 = arith.constant dense<0.000000e+00> : vector<64x128xf32>
    %8 = tpu.matmul %5, %7, %cst_6 {dimension_numbers = #tpu.dot_dimension_numbers<[1], [0], [0], [1], [0, 0, 1, 1], [], []>} : vector<64x128xbf16>, vector<128x128xbf16>, vector<64x128xf32> -> vector<64x128xf32>
    %c0_7 = arith.constant 0 : index
    %c0_8 = arith.constant 0 : index
    %c0_9 = arith.constant 0 : index
    %9 = vector.load %arg4[%c0_7, %c0_8, %c0_9] : memref<5x1x128xf32, #tpu.memory_space<vmem>>, vector<1x1x128xf32>
    %10 = vector.shape_cast %9 : vector<1x1x128xf32> to vector<1x128xf32>
    %11 = vector.broadcast %10 : vector<1x128xf32> to vector<64x128xf32>
    %12 = arith.addf %8, %11 : vector<64x128xf32>
    %cst_10 = arith.constant 0.000000e+00 : f32
    %13 = vector.broadcast %cst_10 : f32 to vector<64x128xf32>
    %14 = arith.maximumf %12, %13 : vector<64x128xf32>
    %15 = arith.truncf %14 : vector<64x128xf32> to vector<64x128xbf16>
    %c0_11 = arith.constant 0 : index
    %c0_12 = arith.constant 0 : index
    %c0_13 = arith.constant 0 : index
    %16 = vector.load %arg5[%c0_11, %c0_12, %c0_13] : memref<5x128x128xbf16, #tpu.memory_space<vmem>>, vector<1x128x128xbf16>
    %17 = vector.shape_cast %16 : vector<1x128x128xbf16> to vector<128x128xbf16>
    %cst_14 = arith.constant dense<0.000000e+00> : vector<64x128xf32>
    %18 = tpu.matmul %15, %17, %cst_14 {dimension_numbers = #tpu.dot_dimension_numbers<[1], [0], [0], [1], [0, 0, 1, 1], [], []>} : vector<64x128xbf16>, vector<128x128xbf16>, vector<64x128xf32> -> vector<64x128xf32>
    %c0_15 = arith.constant 0 : index
    %c0_16 = arith.constant 0 : index
    %c0_17 = arith.constant 0 : index
    %19 = vector.load %arg6[%c0_15, %c0_16, %c0_17] : memref<5x1x128xf32, #tpu.memory_space<vmem>>, vector<1x1x128xf32>
    %20 = vector.shape_cast %19 : vector<1x1x128xf32> to vector<1x128xf32>
    %21 = vector.broadcast %20 : vector<1x128xf32> to vector<64x128xf32>
    %22 = arith.addf %18, %21 : vector<64x128xf32>
    %cst_18 = arith.constant 0.000000e+00 : f32
    %23 = vector.broadcast %cst_18 : f32 to vector<64x128xf32>
    %24 = arith.maximumf %22, %23 : vector<64x128xf32>
    %cst_19 = arith.constant dense<0.000000e+00> : vector<128xf32>
    %25 = vector.multi_reduction <add>, %24, %cst_19 [0] : vector<64x128xf32> to vector<128xf32>
    %26 = vector.shape_cast %25 : vector<128xf32> to vector<1x128xf32>
    %cst_20 = arith.constant 1.562500e-02 : f32
    %27 = vector.broadcast %cst_20 : f32 to vector<1x128xf32>
    %28 = arith.mulf %26, %27 : vector<1x128xf32>
    %29 = arith.mulf %24, %24 : vector<64x128xf32>
    %cst_21 = arith.constant dense<0.000000e+00> : vector<128xf32>
    %30 = vector.multi_reduction <add>, %29, %cst_21 [0] : vector<64x128xf32> to vector<128xf32>
    %31 = vector.shape_cast %30 : vector<128xf32> to vector<1x128xf32>
    %cst_22 = arith.constant 1.562500e-02 : f32
    %32 = vector.broadcast %cst_22 : f32 to vector<1x128xf32>
    %33 = arith.mulf %31, %32 : vector<1x128xf32>
    %34 = arith.mulf %28, %28 : vector<1x128xf32>
    %35 = arith.subf %33, %34 : vector<1x128xf32>
    %cst_23 = arith.constant 0.000000e+00 : f32
    %36 = vector.broadcast %cst_23 : f32 to vector<1x128xf32>
    %37 = arith.maximumf %35, %36 : vector<1x128xf32>
    %c0_24 = arith.constant 0 : index
    %c0_25 = arith.constant 0 : index
    %c0_26 = arith.constant 0 : index
    %38 = vector.load %arg7[%c0_24, %c0_25, %c0_26] : memref<5x1x128xf32, #tpu.memory_space<vmem>>, vector<1x1x128xf32>
    %39 = vector.shape_cast %38 : vector<1x1x128xf32> to vector<1x128xf32>
    %40 = vector.broadcast %28 : vector<1x128xf32> to vector<64x128xf32>
    %41 = arith.subf %24, %40 : vector<64x128xf32>
    %42 = vector.broadcast %39 : vector<1x128xf32> to vector<64x128xf32>
    %43 = arith.mulf %42, %41 : vector<64x128xf32>
    %cst_27 = arith.constant 9.99999974E-6 : f32
    %44 = vector.broadcast %cst_27 : f32 to vector<1x128xf32>
    %45 = arith.addf %37, %44 : vector<1x128xf32>
    %46 = math.rsqrt %45 : vector<1x128xf32>
    %47 = vector.broadcast %46 : vector<1x128xf32> to vector<64x128xf32>
    %48 = arith.mulf %43, %47 : vector<64x128xf32>
    %c0_28 = arith.constant 0 : index
    %c0_29 = arith.constant 0 : index
    %c0_30 = arith.constant 0 : index
    %49 = vector.load %arg8[%c0_28, %c0_29, %c0_30] : memref<5x1x128xf32, #tpu.memory_space<vmem>>, vector<1x1x128xf32>
    %50 = vector.shape_cast %49 : vector<1x1x128xf32> to vector<1x128xf32>
    %51 = vector.broadcast %50 : vector<1x128xf32> to vector<64x128xf32>
    %52 = arith.addf %48, %51 : vector<64x128xf32>
    %53 = arith.truncf %52 : vector<64x128xf32> to vector<64x128xbf16>
    %cst_31 = arith.constant dense<0.000000e+00> : vector<64x128xf32>
    %54 = tpu.matmul %0, %53, %cst_31 {dimension_numbers = #tpu.dot_dimension_numbers<[1], [0], [0], [1], [0, 0, 1, 1], [], []>} : vector<64x64xbf16>, vector<64x128xbf16>, vector<64x128xf32> -> vector<64x128xf32>
    %55 = arith.addf %52, %54 : vector<64x128xf32>
    %56 = arith.truncf %55 : vector<64x128xf32> to vector<64x128xbf16>
    %c1 = arith.constant 1 : index
    %c0_32 = arith.constant 0 : index
    %c0_33 = arith.constant 0 : index
    %57 = vector.load %arg3[%c1, %c0_32, %c0_33] : memref<5x128x128xbf16, #tpu.memory_space<vmem>>, vector<1x128x128xbf16>
    %58 = vector.shape_cast %57 : vector<1x128x128xbf16> to vector<128x128xbf16>
    %cst_34 = arith.constant dense<0.000000e+00> : vector<64x128xf32>
    %59 = tpu.matmul %56, %58, %cst_34 {dimension_numbers = #tpu.dot_dimension_numbers<[1], [0], [0], [1], [0, 0, 1, 1], [], []>} : vector<64x128xbf16>, vector<128x128xbf16>, vector<64x128xf32> -> vector<64x128xf32>
    %c1_35 = arith.constant 1 : index
    %c0_36 = arith.constant 0 : index
    %c0_37 = arith.constant 0 : index
    %60 = vector.load %arg4[%c1_35, %c0_36, %c0_37] : memref<5x1x128xf32, #tpu.memory_space<vmem>>, vector<1x1x128xf32>
    %61 = vector.shape_cast %60 : vector<1x1x128xf32> to vector<1x128xf32>
    %62 = vector.broadcast %61 : vector<1x128xf32> to vector<64x128xf32>
    %63 = arith.addf %59, %62 : vector<64x128xf32>
    %cst_38 = arith.constant 0.000000e+00 : f32
    %64 = vector.broadcast %cst_38 : f32 to vector<64x128xf32>
    %65 = arith.maximumf %63, %64 : vector<64x128xf32>
    %66 = arith.truncf %65 : vector<64x128xf32> to vector<64x128xbf16>
    %c1_39 = arith.constant 1 : index
    %c0_40 = arith.constant 0 : index
    %c0_41 = arith.constant 0 : index
    %67 = vector.load %arg5[%c1_39, %c0_40, %c0_41] : memref<5x128x128xbf16, #tpu.memory_space<vmem>>, vector<1x128x128xbf16>
    %68 = vector.shape_cast %67 : vector<1x128x128xbf16> to vector<128x128xbf16>
    %cst_42 = arith.constant dense<0.000000e+00> : vector<64x128xf32>
    %69 = tpu.matmul %66, %68, %cst_42 {dimension_numbers = #tpu.dot_dimension_numbers<[1], [0], [0], [1], [0, 0, 1, 1], [], []>} : vector<64x128xbf16>, vector<128x128xbf16>, vector<64x128xf32> -> vector<64x128xf32>
    %c1_43 = arith.constant 1 : index
    %c0_44 = arith.constant 0 : index
    %c0_45 = arith.constant 0 : index
    %70 = vector.load %arg6[%c1_43, %c0_44, %c0_45] : memref<5x1x128xf32, #tpu.memory_space<vmem>>, vector<1x1x128xf32>
    %71 = vector.shape_cast %70 : vector<1x1x128xf32> to vector<1x128xf32>
    %72 = vector.broadcast %71 : vector<1x128xf32> to vector<64x128xf32>
    %73 = arith.addf %69, %72 : vector<64x128xf32>
    %cst_46 = arith.constant 0.000000e+00 : f32
    %74 = vector.broadcast %cst_46 : f32 to vector<64x128xf32>
    %75 = arith.maximumf %73, %74 : vector<64x128xf32>
    %cst_47 = arith.constant dense<0.000000e+00> : vector<128xf32>
    %76 = vector.multi_reduction <add>, %75, %cst_47 [0] : vector<64x128xf32> to vector<128xf32>
    %77 = vector.shape_cast %76 : vector<128xf32> to vector<1x128xf32>
    %cst_48 = arith.constant 1.562500e-02 : f32
    %78 = vector.broadcast %cst_48 : f32 to vector<1x128xf32>
    %79 = arith.mulf %77, %78 : vector<1x128xf32>
    %80 = arith.mulf %75, %75 : vector<64x128xf32>
    %cst_49 = arith.constant dense<0.000000e+00> : vector<128xf32>
    %81 = vector.multi_reduction <add>, %80, %cst_49 [0] : vector<64x128xf32> to vector<128xf32>
    %82 = vector.shape_cast %81 : vector<128xf32> to vector<1x128xf32>
    %cst_50 = arith.constant 1.562500e-02 : f32
    %83 = vector.broadcast %cst_50 : f32 to vector<1x128xf32>
    %84 = arith.mulf %82, %83 : vector<1x128xf32>
    %85 = arith.mulf %79, %79 : vector<1x128xf32>
    %86 = arith.subf %84, %85 : vector<1x128xf32>
    %cst_51 = arith.constant 0.000000e+00 : f32
    %87 = vector.broadcast %cst_51 : f32 to vector<1x128xf32>
    %88 = arith.maximumf %86, %87 : vector<1x128xf32>
    %c1_52 = arith.constant 1 : index
    %c0_53 = arith.constant 0 : index
    %c0_54 = arith.constant 0 : index
    %89 = vector.load %arg7[%c1_52, %c0_53, %c0_54] : memref<5x1x128xf32, #tpu.memory_space<vmem>>, vector<1x1x128xf32>
    %90 = vector.shape_cast %89 : vector<1x1x128xf32> to vector<1x128xf32>
    %91 = vector.broadcast %79 : vector<1x128xf32> to vector<64x128xf32>
    %92 = arith.subf %75, %91 : vector<64x128xf32>
    %93 = vector.broadcast %90 : vector<1x128xf32> to vector<64x128xf32>
    %94 = arith.mulf %93, %92 : vector<64x128xf32>
    %cst_55 = arith.constant 9.99999974E-6 : f32
    %95 = vector.broadcast %cst_55 : f32 to vector<1x128xf32>
    %96 = arith.addf %88, %95 : vector<1x128xf32>
    %97 = math.rsqrt %96 : vector<1x128xf32>
    %98 = vector.broadcast %97 : vector<1x128xf32> to vector<64x128xf32>
    %99 = arith.mulf %94, %98 : vector<64x128xf32>
    %c1_56 = arith.constant 1 : index
    %c0_57 = arith.constant 0 : index
    %c0_58 = arith.constant 0 : index
    %100 = vector.load %arg8[%c1_56, %c0_57, %c0_58] : memref<5x1x128xf32, #tpu.memory_space<vmem>>, vector<1x1x128xf32>
    %101 = vector.shape_cast %100 : vector<1x1x128xf32> to vector<1x128xf32>
    %102 = vector.broadcast %101 : vector<1x128xf32> to vector<64x128xf32>
    %103 = arith.addf %99, %102 : vector<64x128xf32>
    %104 = arith.truncf %103 : vector<64x128xf32> to vector<64x128xbf16>
    %cst_59 = arith.constant dense<0.000000e+00> : vector<64x128xf32>
    %105 = tpu.matmul %0, %104, %cst_59 {dimension_numbers = #tpu.dot_dimension_numbers<[1], [0], [0], [1], [0, 0, 1, 1], [], []>} : vector<64x64xbf16>, vector<64x128xbf16>, vector<64x128xf32> -> vector<64x128xf32>
    %106 = arith.addf %103, %105 : vector<64x128xf32>
    %107 = arith.truncf %106 : vector<64x128xf32> to vector<64x128xbf16>
    %c2 = arith.constant 2 : index
    %c0_60 = arith.constant 0 : index
    %c0_61 = arith.constant 0 : index
    %108 = vector.load %arg3[%c2, %c0_60, %c0_61] : memref<5x128x128xbf16, #tpu.memory_space<vmem>>, vector<1x128x128xbf16>
    %109 = vector.shape_cast %108 : vector<1x128x128xbf16> to vector<128x128xbf16>
    %cst_62 = arith.constant dense<0.000000e+00> : vector<64x128xf32>
    %110 = tpu.matmul %107, %109, %cst_62 {dimension_numbers = #tpu.dot_dimension_numbers<[1], [0], [0], [1], [0, 0, 1, 1], [], []>} : vector<64x128xbf16>, vector<128x128xbf16>, vector<64x128xf32> -> vector<64x128xf32>
    %c2_63 = arith.constant 2 : index
    %c0_64 = arith.constant 0 : index
    %c0_65 = arith.constant 0 : index
    %111 = vector.load %arg4[%c2_63, %c0_64, %c0_65] : memref<5x1x128xf32, #tpu.memory_space<vmem>>, vector<1x1x128xf32>
    %112 = vector.shape_cast %111 : vector<1x1x128xf32> to vector<1x128xf32>
    %113 = vector.broadcast %112 : vector<1x128xf32> to vector<64x128xf32>
    %114 = arith.addf %110, %113 : vector<64x128xf32>
    %cst_66 = arith.constant 0.000000e+00 : f32
    %115 = vector.broadcast %cst_66 : f32 to vector<64x128xf32>
    %116 = arith.maximumf %114, %115 : vector<64x128xf32>
    %117 = arith.truncf %116 : vector<64x128xf32> to vector<64x128xbf16>
    %c2_67 = arith.constant 2 : index
    %c0_68 = arith.constant 0 : index
    %c0_69 = arith.constant 0 : index
    %118 = vector.load %arg5[%c2_67, %c0_68, %c0_69] : memref<5x128x128xbf16, #tpu.memory_space<vmem>>, vector<1x128x128xbf16>
    %119 = vector.shape_cast %118 : vector<1x128x128xbf16> to vector<128x128xbf16>
    %cst_70 = arith.constant dense<0.000000e+00> : vector<64x128xf32>
    %120 = tpu.matmul %117, %119, %cst_70 {dimension_numbers = #tpu.dot_dimension_numbers<[1], [0], [0], [1], [0, 0, 1, 1], [], []>} : vector<64x128xbf16>, vector<128x128xbf16>, vector<64x128xf32> -> vector<64x128xf32>
    %c2_71 = arith.constant 2 : index
    %c0_72 = arith.constant 0 : index
    %c0_73 = arith.constant 0 : index
    %121 = vector.load %arg6[%c2_71, %c0_72, %c0_73] : memref<5x1x128xf32, #tpu.memory_space<vmem>>, vector<1x1x128xf32>
    %122 = vector.shape_cast %121 : vector<1x1x128xf32> to vector<1x128xf32>
    %123 = vector.broadcast %122 : vector<1x128xf32> to vector<64x128xf32>
    %124 = arith.addf %120, %123 : vector<64x128xf32>
    %cst_74 = arith.constant 0.000000e+00 : f32
    %125 = vector.broadcast %cst_74 : f32 to vector<64x128xf32>
    %126 = arith.maximumf %124, %125 : vector<64x128xf32>
    %cst_75 = arith.constant dense<0.000000e+00> : vector<128xf32>
    %127 = vector.multi_reduction <add>, %126, %cst_75 [0] : vector<64x128xf32> to vector<128xf32>
    %128 = vector.shape_cast %127 : vector<128xf32> to vector<1x128xf32>
    %cst_76 = arith.constant 1.562500e-02 : f32
    %129 = vector.broadcast %cst_76 : f32 to vector<1x128xf32>
    %130 = arith.mulf %128, %129 : vector<1x128xf32>
    %131 = arith.mulf %126, %126 : vector<64x128xf32>
    %cst_77 = arith.constant dense<0.000000e+00> : vector<128xf32>
    %132 = vector.multi_reduction <add>, %131, %cst_77 [0] : vector<64x128xf32> to vector<128xf32>
    %133 = vector.shape_cast %132 : vector<128xf32> to vector<1x128xf32>
    %cst_78 = arith.constant 1.562500e-02 : f32
    %134 = vector.broadcast %cst_78 : f32 to vector<1x128xf32>
    %135 = arith.mulf %133, %134 : vector<1x128xf32>
    %136 = arith.mulf %130, %130 : vector<1x128xf32>
    %137 = arith.subf %135, %136 : vector<1x128xf32>
    %cst_79 = arith.constant 0.000000e+00 : f32
    %138 = vector.broadcast %cst_79 : f32 to vector<1x128xf32>
    %139 = arith.maximumf %137, %138 : vector<1x128xf32>
    %c2_80 = arith.constant 2 : index
    %c0_81 = arith.constant 0 : index
    %c0_82 = arith.constant 0 : index
    %140 = vector.load %arg7[%c2_80, %c0_81, %c0_82] : memref<5x1x128xf32, #tpu.memory_space<vmem>>, vector<1x1x128xf32>
    %141 = vector.shape_cast %140 : vector<1x1x128xf32> to vector<1x128xf32>
    %142 = vector.broadcast %130 : vector<1x128xf32> to vector<64x128xf32>
    %143 = arith.subf %126, %142 : vector<64x128xf32>
    %144 = vector.broadcast %141 : vector<1x128xf32> to vector<64x128xf32>
    %145 = arith.mulf %144, %143 : vector<64x128xf32>
    %cst_83 = arith.constant 9.99999974E-6 : f32
    %146 = vector.broadcast %cst_83 : f32 to vector<1x128xf32>
    %147 = arith.addf %139, %146 : vector<1x128xf32>
    %148 = math.rsqrt %147 : vector<1x128xf32>
    %149 = vector.broadcast %148 : vector<1x128xf32> to vector<64x128xf32>
    %150 = arith.mulf %145, %149 : vector<64x128xf32>
    %c2_84 = arith.constant 2 : index
    %c0_85 = arith.constant 0 : index
    %c0_86 = arith.constant 0 : index
    %151 = vector.load %arg8[%c2_84, %c0_85, %c0_86] : memref<5x1x128xf32, #tpu.memory_space<vmem>>, vector<1x1x128xf32>
    %152 = vector.shape_cast %151 : vector<1x1x128xf32> to vector<1x128xf32>
    %153 = vector.broadcast %152 : vector<1x128xf32> to vector<64x128xf32>
    %154 = arith.addf %150, %153 : vector<64x128xf32>
    %155 = arith.truncf %154 : vector<64x128xf32> to vector<64x128xbf16>
    %cst_87 = arith.constant dense<0.000000e+00> : vector<64x128xf32>
    %156 = tpu.matmul %0, %155, %cst_87 {dimension_numbers = #tpu.dot_dimension_numbers<[1], [0], [0], [1], [0, 0, 1, 1], [], []>} : vector<64x64xbf16>, vector<64x128xbf16>, vector<64x128xf32> -> vector<64x128xf32>
    %157 = arith.addf %154, %156 : vector<64x128xf32>
    %158 = arith.truncf %157 : vector<64x128xf32> to vector<64x128xbf16>
    %c3 = arith.constant 3 : index
    %c0_88 = arith.constant 0 : index
    %c0_89 = arith.constant 0 : index
    %159 = vector.load %arg3[%c3, %c0_88, %c0_89] : memref<5x128x128xbf16, #tpu.memory_space<vmem>>, vector<1x128x128xbf16>
    %160 = vector.shape_cast %159 : vector<1x128x128xbf16> to vector<128x128xbf16>
    %cst_90 = arith.constant dense<0.000000e+00> : vector<64x128xf32>
    %161 = tpu.matmul %158, %160, %cst_90 {dimension_numbers = #tpu.dot_dimension_numbers<[1], [0], [0], [1], [0, 0, 1, 1], [], []>} : vector<64x128xbf16>, vector<128x128xbf16>, vector<64x128xf32> -> vector<64x128xf32>
    %c3_91 = arith.constant 3 : index
    %c0_92 = arith.constant 0 : index
    %c0_93 = arith.constant 0 : index
    %162 = vector.load %arg4[%c3_91, %c0_92, %c0_93] : memref<5x1x128xf32, #tpu.memory_space<vmem>>, vector<1x1x128xf32>
    %163 = vector.shape_cast %162 : vector<1x1x128xf32> to vector<1x128xf32>
    %164 = vector.broadcast %163 : vector<1x128xf32> to vector<64x128xf32>
    %165 = arith.addf %161, %164 : vector<64x128xf32>
    %cst_94 = arith.constant 0.000000e+00 : f32
    %166 = vector.broadcast %cst_94 : f32 to vector<64x128xf32>
    %167 = arith.maximumf %165, %166 : vector<64x128xf32>
    %168 = arith.truncf %167 : vector<64x128xf32> to vector<64x128xbf16>
    %c3_95 = arith.constant 3 : index
    %c0_96 = arith.constant 0 : index
    %c0_97 = arith.constant 0 : index
    %169 = vector.load %arg5[%c3_95, %c0_96, %c0_97] : memref<5x128x128xbf16, #tpu.memory_space<vmem>>, vector<1x128x128xbf16>
    %170 = vector.shape_cast %169 : vector<1x128x128xbf16> to vector<128x128xbf16>
    %cst_98 = arith.constant dense<0.000000e+00> : vector<64x128xf32>
    %171 = tpu.matmul %168, %170, %cst_98 {dimension_numbers = #tpu.dot_dimension_numbers<[1], [0], [0], [1], [0, 0, 1, 1], [], []>} : vector<64x128xbf16>, vector<128x128xbf16>, vector<64x128xf32> -> vector<64x128xf32>
    %c3_99 = arith.constant 3 : index
    %c0_100 = arith.constant 0 : index
    %c0_101 = arith.constant 0 : index
    %172 = vector.load %arg6[%c3_99, %c0_100, %c0_101] : memref<5x1x128xf32, #tpu.memory_space<vmem>>, vector<1x1x128xf32>
    %173 = vector.shape_cast %172 : vector<1x1x128xf32> to vector<1x128xf32>
    %174 = vector.broadcast %173 : vector<1x128xf32> to vector<64x128xf32>
    %175 = arith.addf %171, %174 : vector<64x128xf32>
    %cst_102 = arith.constant 0.000000e+00 : f32
    %176 = vector.broadcast %cst_102 : f32 to vector<64x128xf32>
    %177 = arith.maximumf %175, %176 : vector<64x128xf32>
    %cst_103 = arith.constant dense<0.000000e+00> : vector<128xf32>
    %178 = vector.multi_reduction <add>, %177, %cst_103 [0] : vector<64x128xf32> to vector<128xf32>
    %179 = vector.shape_cast %178 : vector<128xf32> to vector<1x128xf32>
    %cst_104 = arith.constant 1.562500e-02 : f32
    %180 = vector.broadcast %cst_104 : f32 to vector<1x128xf32>
    %181 = arith.mulf %179, %180 : vector<1x128xf32>
    %182 = arith.mulf %177, %177 : vector<64x128xf32>
    %cst_105 = arith.constant dense<0.000000e+00> : vector<128xf32>
    %183 = vector.multi_reduction <add>, %182, %cst_105 [0] : vector<64x128xf32> to vector<128xf32>
    %184 = vector.shape_cast %183 : vector<128xf32> to vector<1x128xf32>
    %cst_106 = arith.constant 1.562500e-02 : f32
    %185 = vector.broadcast %cst_106 : f32 to vector<1x128xf32>
    %186 = arith.mulf %184, %185 : vector<1x128xf32>
    %187 = arith.mulf %181, %181 : vector<1x128xf32>
    %188 = arith.subf %186, %187 : vector<1x128xf32>
    %cst_107 = arith.constant 0.000000e+00 : f32
    %189 = vector.broadcast %cst_107 : f32 to vector<1x128xf32>
    %190 = arith.maximumf %188, %189 : vector<1x128xf32>
    %c3_108 = arith.constant 3 : index
    %c0_109 = arith.constant 0 : index
    %c0_110 = arith.constant 0 : index
    %191 = vector.load %arg7[%c3_108, %c0_109, %c0_110] : memref<5x1x128xf32, #tpu.memory_space<vmem>>, vector<1x1x128xf32>
    %192 = vector.shape_cast %191 : vector<1x1x128xf32> to vector<1x128xf32>
    %193 = vector.broadcast %181 : vector<1x128xf32> to vector<64x128xf32>
    %194 = arith.subf %177, %193 : vector<64x128xf32>
    %195 = vector.broadcast %192 : vector<1x128xf32> to vector<64x128xf32>
    %196 = arith.mulf %195, %194 : vector<64x128xf32>
    %cst_111 = arith.constant 9.99999974E-6 : f32
    %197 = vector.broadcast %cst_111 : f32 to vector<1x128xf32>
    %198 = arith.addf %190, %197 : vector<1x128xf32>
    %199 = math.rsqrt %198 : vector<1x128xf32>
    %200 = vector.broadcast %199 : vector<1x128xf32> to vector<64x128xf32>
    %201 = arith.mulf %196, %200 : vector<64x128xf32>
    %c3_112 = arith.constant 3 : index
    %c0_113 = arith.constant 0 : index
    %c0_114 = arith.constant 0 : index
    %202 = vector.load %arg8[%c3_112, %c0_113, %c0_114] : memref<5x1x128xf32, #tpu.memory_space<vmem>>, vector<1x1x128xf32>
    %203 = vector.shape_cast %202 : vector<1x1x128xf32> to vector<1x128xf32>
    %204 = vector.broadcast %203 : vector<1x128xf32> to vector<64x128xf32>
    %205 = arith.addf %201, %204 : vector<64x128xf32>
    %206 = arith.truncf %205 : vector<64x128xf32> to vector<64x128xbf16>
    %cst_115 = arith.constant dense<0.000000e+00> : vector<64x128xf32>
    %207 = tpu.matmul %0, %206, %cst_115 {dimension_numbers = #tpu.dot_dimension_numbers<[1], [0], [0], [1], [0, 0, 1, 1], [], []>} : vector<64x64xbf16>, vector<64x128xbf16>, vector<64x128xf32> -> vector<64x128xf32>
    %208 = arith.addf %205, %207 : vector<64x128xf32>
    %209 = arith.truncf %208 : vector<64x128xf32> to vector<64x128xbf16>
    %c4 = arith.constant 4 : index
    %c0_116 = arith.constant 0 : index
    %c0_117 = arith.constant 0 : index
    %210 = vector.load %arg3[%c4, %c0_116, %c0_117] : memref<5x128x128xbf16, #tpu.memory_space<vmem>>, vector<1x128x128xbf16>
    %211 = vector.shape_cast %210 : vector<1x128x128xbf16> to vector<128x128xbf16>
    %cst_118 = arith.constant dense<0.000000e+00> : vector<64x128xf32>
    %212 = tpu.matmul %209, %211, %cst_118 {dimension_numbers = #tpu.dot_dimension_numbers<[1], [0], [0], [1], [0, 0, 1, 1], [], []>} : vector<64x128xbf16>, vector<128x128xbf16>, vector<64x128xf32> -> vector<64x128xf32>
    %c4_119 = arith.constant 4 : index
    %c0_120 = arith.constant 0 : index
    %c0_121 = arith.constant 0 : index
    %213 = vector.load %arg4[%c4_119, %c0_120, %c0_121] : memref<5x1x128xf32, #tpu.memory_space<vmem>>, vector<1x1x128xf32>
    %214 = vector.shape_cast %213 : vector<1x1x128xf32> to vector<1x128xf32>
    %215 = vector.broadcast %214 : vector<1x128xf32> to vector<64x128xf32>
    %216 = arith.addf %212, %215 : vector<64x128xf32>
    %cst_122 = arith.constant 0.000000e+00 : f32
    %217 = vector.broadcast %cst_122 : f32 to vector<64x128xf32>
    %218 = arith.maximumf %216, %217 : vector<64x128xf32>
    %219 = arith.truncf %218 : vector<64x128xf32> to vector<64x128xbf16>
    %c4_123 = arith.constant 4 : index
    %c0_124 = arith.constant 0 : index
    %c0_125 = arith.constant 0 : index
    %220 = vector.load %arg5[%c4_123, %c0_124, %c0_125] : memref<5x128x128xbf16, #tpu.memory_space<vmem>>, vector<1x128x128xbf16>
    %221 = vector.shape_cast %220 : vector<1x128x128xbf16> to vector<128x128xbf16>
    %cst_126 = arith.constant dense<0.000000e+00> : vector<64x128xf32>
    %222 = tpu.matmul %219, %221, %cst_126 {dimension_numbers = #tpu.dot_dimension_numbers<[1], [0], [0], [1], [0, 0, 1, 1], [], []>} : vector<64x128xbf16>, vector<128x128xbf16>, vector<64x128xf32> -> vector<64x128xf32>
    %c4_127 = arith.constant 4 : index
    %c0_128 = arith.constant 0 : index
    %c0_129 = arith.constant 0 : index
    %223 = vector.load %arg6[%c4_127, %c0_128, %c0_129] : memref<5x1x128xf32, #tpu.memory_space<vmem>>, vector<1x1x128xf32>
    %224 = vector.shape_cast %223 : vector<1x1x128xf32> to vector<1x128xf32>
    %225 = vector.broadcast %224 : vector<1x128xf32> to vector<64x128xf32>
    %226 = arith.addf %222, %225 : vector<64x128xf32>
    %cst_130 = arith.constant 0.000000e+00 : f32
    %227 = vector.broadcast %cst_130 : f32 to vector<64x128xf32>
    %228 = arith.maximumf %226, %227 : vector<64x128xf32>
    %cst_131 = arith.constant dense<0.000000e+00> : vector<128xf32>
    %229 = vector.multi_reduction <add>, %228, %cst_131 [0] : vector<64x128xf32> to vector<128xf32>
    %230 = vector.shape_cast %229 : vector<128xf32> to vector<1x128xf32>
    %cst_132 = arith.constant 1.562500e-02 : f32
    %231 = vector.broadcast %cst_132 : f32 to vector<1x128xf32>
    %232 = arith.mulf %230, %231 : vector<1x128xf32>
    %233 = arith.mulf %228, %228 : vector<64x128xf32>
    %cst_133 = arith.constant dense<0.000000e+00> : vector<128xf32>
    %234 = vector.multi_reduction <add>, %233, %cst_133 [0] : vector<64x128xf32> to vector<128xf32>
    %235 = vector.shape_cast %234 : vector<128xf32> to vector<1x128xf32>
    %cst_134 = arith.constant 1.562500e-02 : f32
    %236 = vector.broadcast %cst_134 : f32 to vector<1x128xf32>
    %237 = arith.mulf %235, %236 : vector<1x128xf32>
    %238 = arith.mulf %232, %232 : vector<1x128xf32>
    %239 = arith.subf %237, %238 : vector<1x128xf32>
    %cst_135 = arith.constant 0.000000e+00 : f32
    %240 = vector.broadcast %cst_135 : f32 to vector<1x128xf32>
    %241 = arith.maximumf %239, %240 : vector<1x128xf32>
    %c4_136 = arith.constant 4 : index
    %c0_137 = arith.constant 0 : index
    %c0_138 = arith.constant 0 : index
    %242 = vector.load %arg7[%c4_136, %c0_137, %c0_138] : memref<5x1x128xf32, #tpu.memory_space<vmem>>, vector<1x1x128xf32>
    %243 = vector.shape_cast %242 : vector<1x1x128xf32> to vector<1x128xf32>
    %244 = vector.broadcast %232 : vector<1x128xf32> to vector<64x128xf32>
    %245 = arith.subf %228, %244 : vector<64x128xf32>
    %246 = vector.broadcast %243 : vector<1x128xf32> to vector<64x128xf32>
    %247 = arith.mulf %246, %245 : vector<64x128xf32>
    %cst_139 = arith.constant 9.99999974E-6 : f32
    %248 = vector.broadcast %cst_139 : f32 to vector<1x128xf32>
    %249 = arith.addf %241, %248 : vector<1x128xf32>
    %250 = math.rsqrt %249 : vector<1x128xf32>
    %251 = vector.broadcast %250 : vector<1x128xf32> to vector<64x128xf32>
    %252 = arith.mulf %247, %251 : vector<64x128xf32>
    %c4_140 = arith.constant 4 : index
    %c0_141 = arith.constant 0 : index
    %c0_142 = arith.constant 0 : index
    %253 = vector.load %arg8[%c4_140, %c0_141, %c0_142] : memref<5x1x128xf32, #tpu.memory_space<vmem>>, vector<1x1x128xf32>
    %254 = vector.shape_cast %253 : vector<1x1x128xf32> to vector<1x128xf32>
    %255 = vector.broadcast %254 : vector<1x128xf32> to vector<64x128xf32>
    %256 = arith.addf %252, %255 : vector<64x128xf32>
    %c0_143 = arith.constant 0 : index
    %c0_144 = arith.constant 0 : index
    %257 = vector.load %arg2[%c0_143, %c0_144] : memref<2x64xf32, #tpu.memory_space<vmem>>, vector<2x64xf32>
    %cst_145 = arith.constant dense<0.000000e+00> : vector<2x128xf32>
    %258 = tpu.matmul %257, %256, %cst_145 {dimension_numbers = #tpu.dot_dimension_numbers<[1], [0], [0], [1], [0, 0, 1, 1], [], []>} : vector<2x64xf32>, vector<64x128xf32>, vector<2x128xf32> -> vector<2x128xf32>
    %c0_146 = arith.constant 0 : index
    %c0_147 = arith.constant 0 : index
    %259 = vector.load %arg9[%c0_146, %c0_147] : memref<128x128xf32, #tpu.memory_space<vmem>>, vector<128x128xf32>
    %cst_148 = arith.constant dense<0.000000e+00> : vector<2x128xf32>
    %260 = tpu.matmul %258, %259, %cst_148 {dimension_numbers = #tpu.dot_dimension_numbers<[1], [0], [0], [1], [0, 0, 1, 1], [], []>} : vector<2x128xf32>, vector<128x128xf32>, vector<2x128xf32> -> vector<2x128xf32>
    %c0_149 = arith.constant 0 : index
    %c0_150 = arith.constant 0 : index
    %261 = vector.load %arg10[%c0_149, %c0_150] : memref<1x128xf32, #tpu.memory_space<vmem>>, vector<1x128xf32>
    %262 = vector.broadcast %261 : vector<1x128xf32> to vector<2x128xf32>
    %263 = arith.addf %260, %262 : vector<2x128xf32>
    %cst_151 = arith.constant 0.000000e+00 : f32
    %264 = vector.broadcast %cst_151 : f32 to vector<2x128xf32>
    %265 = arith.maximumf %263, %264 : vector<2x128xf32>
    %c0_152 = arith.constant 0 : index
    %c0_153 = arith.constant 0 : index
    %266 = vector.load %arg11[%c0_152, %c0_153] : memref<128x128xf32, #tpu.memory_space<vmem>>, vector<128x128xf32>
    %cst_154 = arith.constant dense<0.000000e+00> : vector<2x128xf32>
    %267 = tpu.matmul %265, %266, %cst_154 {dimension_numbers = #tpu.dot_dimension_numbers<[1], [0], [0], [1], [0, 0, 1, 1], [], []>} : vector<2x128xf32>, vector<128x128xf32>, vector<2x128xf32> -> vector<2x128xf32>
    %c0_155 = arith.constant 0 : index
    %c0_156 = arith.constant 0 : index
    %268 = vector.load %arg12[%c0_155, %c0_156] : memref<1x128xf32, #tpu.memory_space<vmem>>, vector<1x128xf32>
    %269 = vector.broadcast %268 : vector<1x128xf32> to vector<2x128xf32>
    %270 = arith.addf %267, %269 : vector<2x128xf32>
    %271 = tpu.iota {dimensions = array<i32: 1>} : vector<2x128xi32>
    %c1_i32 = arith.constant 1 : i32
    %272 = vector.broadcast %c1_i32 : i32 to vector<2x128xi32>
    %273 = arith.cmpi slt, %271, %272 : vector<2x128xi32>
    %cst_157 = arith.constant -1.000000e+30 : f32
    %274 = vector.broadcast %cst_157 : f32 to vector<2x128xf32>
    %275 = arith.select %273, %270, %274 : vector<2x128xi1>, vector<2x128xf32>
    %cst_158 = arith.constant dense<0xFF800000> : vector<2xf32>
    %276 = vector.multi_reduction <maximumf>, %275, %cst_158 [1] : vector<2x128xf32> to vector<2xf32>
    %277 = vector.shape_cast %276 : vector<2xf32> to vector<2x1xf32>
    %278 = vector.broadcast %277 : vector<2x1xf32> to vector<2x128xf32>
    %279 = arith.subf %275, %278 : vector<2x128xf32>
    %280 = math.exp %279 : vector<2x128xf32>
    %cst_159 = arith.constant 0.000000e+00 : f32
    %281 = vector.broadcast %cst_159 : f32 to vector<2x128xf32>
    %282 = arith.select %273, %280, %281 : vector<2x128xi1>, vector<2x128xf32>
    %cst_160 = arith.constant dense<0.000000e+00> : vector<2xf32>
    %283 = vector.multi_reduction <add>, %282, %cst_160 [1] : vector<2x128xf32> to vector<2xf32>
    %284 = vector.shape_cast %283 : vector<2xf32> to vector<2x1xf32>
    %285 = math.log %284 : vector<2x1xf32>
    %286 = arith.addf %277, %285 : vector<2x1xf32>
    %287 = vector.broadcast %286 : vector<2x1xf32> to vector<2x128xf32>
    %288 = arith.subf %275, %287 : vector<2x128xf32>
    %c0_161 = arith.constant 0 : index
    %c0_162 = arith.constant 0 : index
    %289 = vector.load %arg13[%c0_161, %c0_162] : memref<2x128xf32, #tpu.memory_space<vmem>>, vector<2x128xf32>
    tpu.vector_store %arg13[%c0_161, %c0_162], %288 {strides = array<i32>} : memref<2x128xf32, #tpu.memory_space<vmem>>, vector<2x128xf32>,
    return
  }
}

</mosaic_0001>

<bundles_post_ra>
// kernel: tpu_custom_call.1
= control target key start
LH: loop header
LB: loop body
LE: loop exit
PB: predicated region body
PF: predicated region fallthrough
CT: control target
= control target key end

     0   :  { %18 = vsyncpa [#allocation3], 0  ;;  %s4407_s0 = inlined_call_operand.hbm [shape: bf16[64,64], index: 0, kind: input, shape index: {}]   ;;  %s4408_s1 = inlined_call_operand.hbm [shape: f32[64,128], index: 1, kind: input, shape index: {}]   ;;  %s4409_s2 = inlined_call_operand.hbm [shape: f32[2,64], index: 2, kind: input, shape index: {}]   ;;  %s4410_s3 = inlined_call_operand.hbm [shape: bf16[5,128,128], index: 3, kind: input, shape index: {}]   ;;  %s4411_s4 = inlined_call_operand.vmem [shape: f32[5,1,128], index: 4, kind: input, shape index: {}]   ;;  %s4412_s5 = inlined_call_operand.hbm [shape: bf16[5,128,128], index: 5, kind: input, shape index: {}]   ;;  %s4413_s6 = inlined_call_operand.vmem [shape: f32[5,1,128], index: 6, kind: input, shape index: {}]   ;;  %s4414_s7 = inlined_call_operand.hbm [shape: f32[5,1,128], index: 7, kind: input, shape index: {}]   ;;  %s4415_s8 = inlined_call_operand.hbm [shape: f32[5,1,128], index: 8, kind: input, shape index: {}]   ;;  %s4416_s9 = inlined_call_operand.hbm [shape: f32[128,128], index: 9, kind: input, shape index: {}]   ;;  %s4417_s10 = inlined_call_operand.vmem [shape: f32[1,128], index: 10, kind: input, shape index: {}]   ;;  %s4418_s11 = inlined_call_operand.hbm [shape: f32[128,128], index: 11, kind: input, shape index: {}]   ;;  %s4419_s12 = inlined_call_operand.vmem [shape: f32[1,128], index: 12, kind: input, shape index: {}]   ;;  %s4420_s13 = inlined_call_operand.hbm [shape: f32[2,128], index: 13, kind: output, shape index: {}]  }
   0x1   :  { %19 = vsyncpa [#allocation6], 0 }
   0x2   :  { %20 = vsyncpa [#allocation9], 0 }
   0x3   :  { %21 = vsyncpa [#allocation12], 0 }
   0x4   :  { %22 = vsyncpa [#allocation15], 0 }
   0x5   :  { %23 = vsyncpa [#allocation4], 0  ;;  %s3918_s25 = smov [#allocation5]  }
   0x6   :  { %s41_s26 = sshll.u32 %s3918_s25, 4  ;;  %s42_s26 = int_to_ptr.vmem [resolvable:$true] %s41_s26 }
   0x7   :  { %s3714_s27 = scalar_lea.vmem %s42_s26, 1024  ;;  %p3719_p1 = scmp.lt.s32.totalorder %s42_s26, %s42_s26 }
   0x8   :  { %p3715_p0 = scmp.ne.s32.totalorder %s42_s26, %s3714_s27  ;;  %p3720_p2 = scmp.lt.s32.totalorder %s3714_s27, %s3714_s27 }
   0xa   :  { %p3721_p3 = por %p3720_p2, %p3719_p1 }
   0xc   :  { %p3722_p4 = pnand %p3721_p3, %p3715_p0 }
   0xe   :  { %3725 = shalt.err (!%p3722_p4)
}
   0xf   :  { %s3919_s28 = smov 128   ;;  %s3920_s29 = smov 8  }
  0x10   :  { %47 = dma.hbm_to_vmem [thread:$0]  %s4408_s1, 1024, %s42_s26, [#allocation6], %s3919_s28, %s3919_s28, %s3920_s29  }
  0x11   :  { %s3921_s15 = smov [#allocation8]   ;;  %s3922_s17 = smov [#allocation11]  }
  0x12   :  { %s63_s16 = sshll.u32 %s3921_s15, 4  ;;  %s91_s18 = sshll.u32 %s3922_s17, 4  ;;  %s64_s16 = int_to_ptr.vmem [resolvable:$true] %s63_s16  ;;  %s92_s18 = int_to_ptr.vmem [resolvable:$true] %s91_s18 }
  0x13   :  { %s3734_s19 = scalar_lea.vmem %s64_s16, 5120  ;;  %p3739_p6 = scmp.lt.s32.totalorder %s64_s16, %s64_s16 }
  0x14   :  { %p3735_p5 = scmp.ne.s32.totalorder %s64_s16, %s3734_s19  ;;  %p3740_p7 = scmp.lt.s32.totalorder %s3734_s19, %s3734_s19 }
  0x16   :  { %p3741_p8 = por %p3740_p7, %p3739_p6 }
  0x18   :  { %p3742_p9 = pnand %p3741_p8, %p3735_p5 }
  0x1a   :  { %3745 = shalt.err (!%p3742_p9)
}
  0x1b   :  { %s3923_s20 = smov 64   ;;  %s3924_s21 = smov 4  }
  0x1c   :  { %69 = dma.hbm_to_vmem [thread:$0]  %s4410_s3, 5120, %s64_s16, [#allocation9], %s3923_s20, %s3923_s20, %s3924_s21  }
  0x1d   :  { %s3754_s1 = scalar_lea.vmem %s92_s18, 80  ;;  %s3758_s24 = scalar_lea.vmem %s92_s18, 96 }
  0x1e   :  { %p3755_p10 = scmp.ne.s32.totalorder %s92_s18, %s3754_s1  ;;  %p3759_p11 = scmp.lt.s32.totalorder %s92_s18, %s92_s18 }
  0x1f   :  { %p3760_p12 = scmp.lt.s32.totalorder %s3758_s24, %s3754_s1 }
  0x21   :  { %p3761_p13 = por %p3760_p12, %p3759_p11 }
  0x23   :  { %p3762_p0 = pnand %p3761_p13, %p3755_p10 }
  0x25   :  { %3765 = shalt.err (!%p3762_p0)
}
  0x26   :  { %s3925_s25 = smov 16   ;;  %s3926_s26 = smov 1  }
  0x27   :  { %97 = dma.hbm_to_vmem [thread:$0]  %s4414_s7, 80, %s92_s18, [#allocation12], %s3925_s25, %s3925_s25, %s3926_s26  }
  0x28   :  { %s3927_s14 = smov [#allocation14]   ;;  %s3928_s15 = smov [#allocation2]  }
  0x29   :  { %s115_s3 = sshll.u32 %s3927_s14, 4  ;;  %s29_s16 = sshll.u32 %s3928_s15, 4  ;;  %s116_s3 = int_to_ptr.vmem [resolvable:$true] %s115_s3  ;;  %s30_s16 = int_to_ptr.vmem [resolvable:$true] %s29_s16 }
  0x2a   :  { %s3774_s17 = scalar_lea.vmem %s116_s3, 2048  ;;  %p3779_p2 = scmp.lt.s32.totalorder %s116_s3, %s116_s3 }
  0x2b   :  { %p3775_p1 = scmp.ne.s32.totalorder %s116_s3, %s3774_s17  ;;  %p3780_p3 = scmp.lt.s32.totalorder %s3774_s17, %s3774_s17 }
  0x2d   :  { %p3781_p4 = por %p3780_p3, %p3779_p2 }
  0x2f   :  { %p3782_p5 = pnand %p3781_p4, %p3775_p1 }
  0x31   :  { %3785 = shalt.err (!%p3782_p5)
}
  0x32   :  { %121 = dma.hbm_to_vmem [thread:$0]  %s4416_s9, 2048, %s116_s3, [#allocation15], %s3919_s28, %s3919_s28, %s3920_s29  }
  0x33   :  { %s3794_s7 = scalar_lea.vmem %s30_s16, 512  ;;  %p3799_p7 = scmp.lt.s32.totalorder %s30_s16, %s30_s16 }
  0x34   :  { %p3795_p6 = scmp.ne.s32.totalorder %s30_s16, %s3794_s7  ;;  %p3800_p8 = scmp.lt.s32.totalorder %s3794_s7, %s3794_s7 }
  0x36   :  { %p3801_p9 = por %p3800_p8, %p3799_p7 }
  0x38   :  { %p3802_p10 = pnand %p3801_p9, %p3795_p6 }
  0x3a   :  { %3805 = shalt.err (!%p3802_p10)
}
  0x3b   :  { %35 = dma.hbm_to_vmem [thread:$0]  %s4407_s0, 512, %s30_s16, [#allocation3], %s3923_s20, %s3923_s20, %s3924_s21  }
  0x3c   :  { %s3929_s1 = smov [#allocation7]   ;;  %s3930_s27 = smov [#allocation10]  }
  0x3d   :  { %s54_s24 = sshll.u32 %s3929_s1, 4  ;;  %s77_s9 = sshll.u32 %s3930_s27, 4  ;;  %s55_s24 = int_to_ptr.vmem [resolvable:$true] %s54_s24  ;;  %s78_s9 = int_to_ptr.vmem [resolvable:$true] %s77_s9 }
  0x3e   :  { %s3814_s30 = scalar_lea.vmem %s55_s24, 32  ;;  %p3819_p12 = scmp.lt.s32.totalorder %s55_s24, %s55_s24 }
  0x3f   :  { %p3815_p11 = scmp.ne.s32.totalorder %s55_s24, %s3814_s30  ;;  %p3820_p13 = scmp.lt.s32.totalorder %s3814_s30, %s3814_s30 }
  0x41   :  { %p3821_p0 = por %p3820_p13, %p3819_p12 }
  0x43   :  { %p3822_p1 = pnand %p3821_p0, %p3815_p11 }
  0x45   :  { %3825 = shalt.err (!%p3822_p1)
}
  0x46   :  { %57 = dma.hbm_to_vmem [thread:$0]  %s4409_s2, 32, %s55_s24, [#allocation6]  }
  0x47   :  { %s3834_s15 = scalar_lea.vmem %s78_s9, 5120  ;;  %p3839_p3 = scmp.lt.s32.totalorder %s78_s9, %s78_s9 }
  0x48   :  { %p3835_p2 = scmp.ne.s32.totalorder %s78_s9, %s3834_s15  ;;  %p3840_p4 = scmp.lt.s32.totalorder %s3834_s15, %s3834_s15 }
  0x4a   :  { %p3841_p5 = por %p3840_p4, %p3839_p3 }
  0x4c   :  { %p3842_p6 = pnand %p3841_p5, %p3835_p2 }
  0x4e   :  { %3845 = shalt.err (!%p3842_p6)
}
  0x4f   :  { %83 = dma.hbm_to_vmem [thread:$0]  %s4412_s5, 5120, %s78_s9, [#allocation9], %s3923_s20, %s3923_s20, %s3924_s21  }
  0x50   :  { %s3931_s17 = smov [#allocation13]   ;;  %s3932_s22 = smov [#allocation16]  }
  0x51   :  { %s103_s19 = sshll.u32 %s3931_s17, 4  ;;  %s129_s2 = sshll.u32 %s3932_s22, 4  ;;  %s104_s19 = int_to_ptr.vmem [resolvable:$true] %s103_s19  ;;  %s130_s2 = int_to_ptr.vmem [resolvable:$true] %s129_s2 }
  0x52   :  { %s3854_s7 = scalar_lea.vmem %s104_s19, 80  ;;  %s3858_s18 = scalar_lea.vmem %s104_s19, 96 }
  0x53   :  { %p3855_p7 = scmp.ne.s32.totalorder %s104_s19, %s3854_s7  ;;  %p3859_p8 = scmp.lt.s32.totalorder %s104_s19, %s104_s19 }
  0x54   :  { %p3860_p9 = scmp.lt.s32.totalorder %s3858_s18, %s3854_s7 }
  0x56   :  { %p3861_p10 = por %p3860_p9, %p3859_p8 }
  0x58   :  { %p3862_p11 = pnand %p3861_p10, %p3855_p7 }
  0x5a   :  { %3865 = shalt.err (!%p3862_p11)
}
  0x5b   :  { %109 = dma.hbm_to_vmem [thread:$0]  %s4415_s8, 80, %s104_s19, [#allocation12], %s3925_s25, %s3925_s25, %s3926_s26  }
  0x5c   :  { %s3874_s5 = scalar_lea.vmem %s130_s2, 2048  ;;  %p3879_p13 = scmp.lt.s32.totalorder %s130_s2, %s130_s2 }
  0x5d   :  { %p3875_p12 = scmp.ne.s32.totalorder %s130_s2, %s3874_s5  ;;  %p3880_p0 = scmp.lt.s32.totalorder %s3874_s5, %s3874_s5 }
  0x5f   :  { %p3881_p1 = por %p3880_p0, %p3879_p13 }
  0x61   :  { %p3882_p2 = pnand %p3881_p1, %p3875_p12 }
  0x63   :  { %3885 = shalt.err (!%p3882_p2)
}
  0x64   :  { %135 = dma.hbm_to_vmem [thread:$0]  %s4418_s11, 2048, %s130_s2, [#allocation15], %s3919_s28, %s3919_s28, %s3920_s29  }
  0x65   :  { %3906 = dma.done.wait [#allocation3], 512  }
  0x66   :  { %3907 = vsyncadd [#allocation3], 4294966784 }
  0x67   :  { %3908 = dma.done.wait [#allocation6], 1056  }
  0x68   :  { %3909 = vsyncadd [#allocation6], 4294966240 }
  0x69   :  { %3910 = dma.done.wait [#allocation9], 10240  }
  0x6a   :  { %3911 = vsyncadd [#allocation9], 4294957056 }
  0x6b   :  { %3912 = dma.done.wait [#allocation12], 160  }
  0x6c   :  { %3913 = vsyncadd [#allocation12], 4294967136 }
  0x6d   :  { %3914 = dma.done.wait [#allocation15], 4096  }
  0x6e   :  { %3915 = vsyncadd [#allocation15], 4294963200  ;;  %v4057_v0 = vld [vmem:[#allocation5 + $0x30] sm:$0xff]  ;;  %v4059_v1 = vld [vmem:[#allocation5 + $0x38] sm:$0xff]  ;;  %vm206_vm0 = vcmask 523264   ;;  %vm3934_vm1 = vmmov 0  }
  0x6f   :  { %v4061_v2 = vld [vmem:[#allocation5 + $0x20] sm:$0xff]  ;;  %v185_v3 = vpack.c.bf16 %v4059_v1, %v4057_v0  ;;  %v4065_v4 = vld [vmem:[#allocation5 + $0x28] sm:$0xff]  ;;  %v4069_v6 = vld [vmem:[#allocation5 + $0x10] sm:$0xff]  ;;  %vm2804_vm3 = vcmask 1041408  }
  0x70   :  { %v184_v5 = vpack.c.bf16 %v4065_v4, %v4061_v2  ;;  %v4071_v7 = vld [vmem:[#allocation5 + $0x18] sm:$0xff]  ;;  %v4073_v8 = vld [vmem:[#allocation2] sm:$0xff]   ;;  %v175_v11 = vld [vmem:[#allocation5 + $0x8] sm:$0xff] }
  0x71   :  { %3177 = vmatprep.subr.bf16.mxu0 %v185_v3  ;;  %v183_v9 = vpack.c.bf16 %v4071_v7, %v4069_v6  ;;  %v174_v10 = vld [vmem:[#allocation5] sm:$0xff]  ;;  %3185 = vmatprep.mubr.msk.bf16.mxu0 %vm206_vm0, %v4073_v8  ;;  %v3609_v13 = vld [vmem:[#allocation8 + $0x30] sm:$0xff]   ;;  %v3610_v15 = vld [vmem:[#allocation8 + $0x28] sm:$0xff]  }
  0x72   :  { %3178 = vmatpush3.bf16.msra.mxu0 %v185_v3  ;;  %v3608_v12 = vld [vmem:[#allocation8 + $0x38] sm:$0xff]   ;;  %v182_v14 = vpack.c.bf16 %v175_v11, %v174_v10  ;;  %v4079_v16 = vld [vmem:[#allocation2 + $0x8] sm:$0xff]   ;;  %v4081_v18 = vld [vmem:[#allocation2 + $0x10] sm:$0xff]  }
  0x73   :  { %3179 = vmatprep.subr.bf16.mxu0 %v184_v5  ;;  %3193 = vmatprep.subr.bf16.mxu1 %v3608_v12  ;;  %v3611_v17 = vld [vmem:[#allocation8 + $0x20] sm:$0xff]   ;;  %v3612_v19 = vld [vmem:[#allocation8 + $0x18] sm:$0xff]   ;;  %v3613_v21 = vld [vmem:[#allocation8 + $0x10] sm:$0xff]  }
  0x74   :  { %3194 = vmatpush3.bf16.msra.mxu1 %v3608_v12  ;;  %v4087_v20 = vld [vmem:[#allocation2 + $0x18] sm:$0xff]   ;;  %v3614_v22 = vld [vmem:[#allocation8 + $0x8] sm:$0xff]   ;;  %v3615_v23 = vld [vmem:[#allocation8] sm:$0xff]  }
  0x75   :  { %3195 = vmatprep.subr.bf16.mxu1 %v3609_v13  ;;  %v3616_v24 = vld [vmem:[#allocation10 + $0x38] sm:$0xff]   ;;  %v3617_v25 = vld [vmem:[#allocation10 + $0x30] sm:$0xff]   ;;  %v3618_v26 = vld [vmem:[#allocation10 + $0x28] sm:$0xff]  }
  0x76   :  { %3180 = vmatpush3.bf16.msra.mxu0 %v184_v5  ;;  %v3619_v27 = vld [vmem:[#allocation10 + $0x20] sm:$0xff]   ;;  %v3620_v28 = vld [vmem:[#allocation10 + $0x18] sm:$0xff]   ;;  %v3621_v49 = vld [vmem:[#allocation10 + $0x10] sm:$0xff]  }
  0x77   :  { %3181 = vmatprep.subr.bf16.mxu0 %v183_v9  ;;  %v3622_v50 = vld [vmem:[#allocation10 + $0x8] sm:$0xff]   ;;  %v3623_v51 = vld [vmem:[#allocation10] sm:$0xff]   ;;  %v2847_v54 = vld [vmem:[%s4411_s4] ss:$0 sm:$0xff] }
  0x78   :  { %3196 = vmatpush3.bf16.msra.mxu1 %v3609_v13 }
  0x79   :  { %3197 = vmatprep.subr.bf16.mxu1 %v3610_v15 }
  0x7a   :  { %3182 = vmatpush3.bf16.msra.mxu0 %v183_v9 }
  0x7b   :  { %3183 = vmatprep.subr.bf16.mxu0 %v182_v14 }
  0x7c   :  { %3198 = vmatpush3.bf16.msra.mxu1 %v3610_v15 }
  0x7d   :  { %3199 = vmatprep.subr.bf16.mxu1 %v3611_v17 }
  0x7e   :  { %3184 = vmatpush3.bf16.msra.mxu0 %v182_v14 }
  0x7f   :  { %3217 = vmatprep.subr.bf16.mxu0 %v3616_v24 }
  0x80   :  { %3200 = vmatpush3.bf16.msra.mxu1 %v3611_v17 }
  0x81   :  { %3186 = vmatmul.mubr.msk.bf16.vlgmr.msra.gmra.mxu0 %vm206_vm0, %v4079_v16  ;;  %3201 = vmatprep.subr.bf16.mxu1 %v3612_v19 }
  0x82   :  { %3189 = vmatprep.mubr.msk.bf16.mxu0 %vm206_vm0, %v4081_v18  ;;  %3218 = vmatpush3.bf16.msra.mxu0 %v3616_v24  ;;  %v3627_v24 = vld [vmem:[#allocation8 + $0x60] sm:$0xff]  }
  0x83   :  { %3219 = vmatprep.subr.bf16.mxu0 %v3617_v25 }
  0x84   :  { %3202 = vmatpush3.bf16.msra.mxu1 %v3612_v19 }
  0x85   :  { %3203 = vmatprep.subr.bf16.mxu1 %v3613_v21 }
  0x86   :  { %3220 = vmatpush3.bf16.msra.mxu0 %v3617_v25  ;;  %v3628_v25 = vld [vmem:[#allocation8 + $0x58] sm:$0xff]  }
  0x87   :  { %3221 = vmatprep.subr.bf16.mxu0 %v3618_v26 }
  0x88   :  { %3204 = vmatpush3.bf16.msra.mxu1 %v3613_v21  ;;  %v3624_v21 = vld [vmem:[#allocation8 + $0x78] sm:$0xff]  }
  0x89   :  { %3190 = vmatmul.mubr.msk.bf16.gmra.mxu0 %vm206_vm0, %v4087_v20  ;;  %3205 = vmatprep.subr.bf16.mxu1 %v3614_v22 }
  0x8a   :  { %3222 = vmatpush3.bf16.msra.mxu0 %v3618_v26 }
  0x8b   :  { %3223 = vmatprep.subr.bf16.mxu0 %v3619_v27 }
  0x8c   :  { %3206 = vmatpush3.bf16.msra.mxu1 %v3614_v22  ;;  %v3625_v22 = vld [vmem:[#allocation8 + $0x70] sm:$0xff]  }
  0x8d   :  { %3207 = vmatprep.subr.bf16.mxu1 %v3615_v23 }
  0x8e   :  { %3224 = vmatpush3.bf16.msra.mxu0 %v3619_v27  ;;  %v2856_v27 = vld [vmem:[%s4413_s6] ss:$0 sm:$0xff] }
  0x8f   :  { %3225 = vmatprep.subr.bf16.mxu0 %v3620_v28 }
  0x90   :  { %3208 = vmatpush3.bf16.msra.mxu1 %v3615_v23  ;;  %v3626_v23 = vld [vmem:[#allocation8 + $0x68] sm:$0xff]  }
  0x92   :  { %3226 = vmatpush3.bf16.msra.mxu0 %v3620_v28 }
  0x93   :  { %3227 = vmatprep.subr.bf16.mxu0 %v3621_v49 }
  0x96   :  { %3228 = vmatpush3.bf16.msra.mxu0 %v3621_v49 }
  0x97   :  { %3229 = vmatprep.subr.bf16.mxu0 %v3622_v50 }
  0x9a   :  { %3230 = vmatpush3.bf16.msra.mxu0 %v3622_v50 }
  0x9b   :  { %3231 = vmatprep.subr.bf16.mxu0 %v3623_v51 }
  0x9e   :  { %3232 = vmatpush3.bf16.msra.mxu0 %v3623_v51 }
  0x9f   :  { %3257 = vmatprep.subr.bf16.mxu0 %v3624_v21 }
 0x141   :  { %v3187_v29 = vpop.f32.mrf.mxu0 }
 0x142   :  { %v286_v36 = vadd.f32 %v3187_v29, %v4069_v6 }
 0x143   :  { %v253_v30 = vpop.f32.mrf.mxu0 }
 0x144   :  { %v284_v34 = vadd.f32 %v253_v30, %v174_v10 }
 0x145   :  { %v3188_v31 = vpop.f32.mrf.mxu0 }
 0x146   :  { %v287_v32 = vadd.f32 %v3188_v31, %v4071_v7 }
 0x147   :  { %v256_v33 = vpop.f32.mrf.mxu0 }
 0x148   :  { %v285_v35 = vadd.f32 %v256_v33, %v175_v11  ;;  %v293_v39 = vpack.c.bf16 %v287_v32, %v286_v36 }
 0x149   :  { %v3191_v37 = vpop.f32.mrf.mxu0 }
 0x14a   :  { %v292_v38 = vpack.c.bf16 %v285_v35, %v284_v34  ;;  %v290_v46 = vadd.f32 %v3191_v37, %v4057_v0 }
 0x14b   :  { %v269_v40 = vpop.f32.mrf.mxu0 }
 0x14c   :  { %3209 = vmatprep.mubr.bf16.mxu1 %v292_v38  ;;  %v288_v44 = vadd.f32 %v269_v40, %v4061_v2 }
 0x14d   :  { %v3192_v41 = vpop.f32.mrf.mxu0  ;;  %3210 = vmatmul.mubr.bf16.vlgmr.msra.gmra.mxu1 %v293_v39 }
 0x14e   :  { %v291_v42 = vadd.f32 %v3192_v41, %v4059_v1 }
 0x14f   :  { %v272_v43 = vpop.f32.mrf.mxu0 }
 0x150   :  { %v289_v45 = vadd.f32 %v272_v43, %v4065_v4  ;;  %v295_v48 = vpack.c.bf16 %v291_v42, %v290_v46 }
 0x152   :  { %v294_v47 = vpack.c.bf16 %v289_v45, %v288_v44 }
 0x154   :  { %3213 = vmatprep.mubr.bf16.mxu1 %v294_v47 }
 0x155   :  { %3214 = vmatmul.mubr.bf16.gmra.mxu1 %v295_v48 }
 0x156   :  { %3249 = vmatprep.mubr.msk.bf16.mxu1 %vm206_vm0, %v4073_v8 }
 0x20d   :  { %v3211_v52 = vpop.f32.mrf.mxu1 }
 0x20e   :  { %v410_v58 = vadd.f32 %v3211_v52, %v2847_v54 }
 0x20f   :  { %v401_v53 = vpop.f32.mrf.mxu1 }
 0x210   :  { %v402_v56 = vadd.f32 %v2847_v54, %v401_v53  ;;  %v434_v1 = vmax.f32 %v410_v58, 0.0 }
 0x211   :  { %v3212_v55 = vpop.f32.mrf.mxu1 }
 0x212   :  { %v413_v57 = vadd.f32 %v3212_v55, %v2847_v54  ;;  %v432_v63 = vmax.f32 %v402_v56, 0.0 }
 0x213   :  { %v404_v59 = vpop.f32.mrf.mxu1 }
 0x214   :  { %v405_v60 = vadd.f32 %v2847_v54, %v404_v59  ;;  %v435_v61 = vmax.f32 %v413_v57, 0.0 }
 0x215   :  { %v3215_v62 = vpop.f32.mrf.mxu1 }
 0x216   :  { %v433_v0 = vmax.f32 %v405_v60, 0.0  ;;  %v441_v4 = vpack.c.bf16 %v435_v61, %v434_v1  ;;  %v426_v9 = vadd.f32 %v3215_v62, %v2847_v54 }
 0x217   :  { %v417_v2 = vpop.f32.mrf.mxu1 }
 0x218   :  { %v440_v3 = vpack.c.bf16 %v433_v0, %v432_v63  ;;  %v418_v6 = vadd.f32 %v2847_v54, %v417_v2  ;;  %v438_v15 = vmax.f32 %v426_v9, 0.0 }
 0x219   :  { %v3216_v5 = vpop.f32.mrf.mxu1 }
 0x21a   :  { %v429_v7 = vadd.f32 %v3216_v5, %v2847_v54  ;;  %3233 = vmatprep.mubr.bf16.mxu0 %v440_v3  ;;  %v436_v13 = vmax.f32 %v418_v6, 0.0 }
 0x21b   :  { %v420_v10 = vpop.f32.mrf.mxu1  ;;  %3234 = vmatmul.mubr.bf16.vlgmr.msra.gmra.mxu0 %v441_v4 }
 0x21c   :  { %v421_v11 = vadd.f32 %v2847_v54, %v420_v10  ;;  %v439_v12 = vmax.f32 %v429_v7, 0.0  ;;  %3258 = vmatpush3.bf16.msra.mxu0 %v3624_v21 }
 0x21d   :  { %3259 = vmatprep.subr.bf16.mxu0 %v3625_v22 }
 0x21e   :  { %v437_v14 = vmax.f32 %v421_v11, 0.0  ;;  %v443_v19 = vpack.c.bf16 %v439_v12, %v438_v15 }
 0x220   :  { %v442_v17 = vpack.c.bf16 %v437_v14, %v436_v13  ;;  %3260 = vmatpush3.bf16.msra.mxu0 %v3625_v22 }
 0x221   :  { %3261 = vmatprep.subr.bf16.mxu0 %v3626_v23 }
 0x222   :  { %3237 = vmatprep.mubr.bf16.mxu0 %v442_v17 }
 0x223   :  { %3238 = vmatmul.mubr.bf16.gmra.mxu0 %v443_v19 }
 0x224   :  { %3262 = vmatpush3.bf16.msra.mxu0 %v3626_v23 }
 0x225   :  { %3263 = vmatprep.subr.bf16.mxu0 %v3627_v24 }
 0x228   :  { %3264 = vmatpush3.bf16.msra.mxu0 %v3627_v24 }
 0x229   :  { %3265 = vmatprep.subr.bf16.mxu0 %v3628_v25 }
 0x22c   :  { %3266 = vmatpush3.bf16.msra.mxu0 %v3628_v25 }
 0x2db   :  { %v3235_v26 = vpop.f32.mrf.mxu0 }
 0x2dc   :  { %v558_v31 = vadd.f32 %v3235_v26, %v2856_v27 }
 0x2dd   :  { %v549_v28 = vpop.f32.mrf.mxu0 }
 0x2de   :  { %v550_v29 = vadd.f32 %v2856_v27, %v549_v28  ;;  %v4107_v37 = vmax.f32 %v558_v31, 0.0 }
 0x2df   :  { %v3236_v30 = vpop.f32.mrf.mxu0 }
 0x2e0   :  { %v561_v32 = vadd.f32 %v3236_v30, %v2856_v27  ;;  %v4105_v34 = vmax.f32 %v550_v29, 0.0  ;;  %v604_v47 = vmul.f32 %v4107_v37, %v4107_v37 }
 0x2e1   :  { %v552_v33 = vpop.f32.mrf.mxu0 }
 0x2e2   :  { %v553_v35 = vadd.f32 %v2856_v27, %v552_v33  ;;  %v4111_v39 = vmax.f32 %v561_v32, 0.0  ;;  %v602_v41 = vmul.f32 %v4105_v34, %v4105_v34 }
 0x2e3   :  { %v3239_v36 = vpop.f32.mrf.mxu0 }
 0x2e4   :  { %v4109_v38 = vmax.f32 %v553_v35, 0.0  ;;  %v574_v45 = vadd.f32 %v3239_v36, %v2856_v27  ;;  %v605_v51 = vmul.f32 %v4111_v39, %v4111_v39  ;;  %v2865_v36 = vld [vmem:[#allocation11] ss:$0 sm:$0xff] }
 0x2e5   :  { %v565_v40 = vpop.f32.mrf.mxu0 }
 0x2e6   :  { %v588_v42 = vadd.f32 %v4109_v38, %v4105_v34  ;;  %v603_v43 = vmul.f32 %v4109_v38, %v4109_v38  ;;  %v566_v44 = vadd.f32 %v2856_v27, %v565_v40  ;;  %v586_v57 = vmax.f32 %v574_v45, 0.0 }
 0x2e7   :  { %v3240_v46 = vpop.f32.mrf.mxu0 }
 0x2e8   :  { %v589_v48 = vadd.f32 %v588_v42, %v4107_v37  ;;  %v610_v49 = vadd.f32 %v603_v43, %v602_v41  ;;  %v584_v50 = vmax.f32 %v566_v44, 0.0  ;;  %v577_v55 = vadd.f32 %v3240_v46, %v2856_v27 }
 0x2e9   :  { %v568_v52 = vpop.f32.mrf.mxu0  ;;  %v608_v2 = vmul.f32 %v586_v57, %v586_v57 }
 0x2ea   :  { %v611_v53 = vadd.f32 %v610_v49, %v604_v47  ;;  %v590_v54 = vadd.f32 %v589_v48, %v4111_v39  ;;  %v569_v56 = vadd.f32 %v2856_v27, %v568_v52  ;;  %v606_v59 = vmul.f32 %v584_v50, %v584_v50  ;;  %v2866_v47 = vld [vmem:[#allocation13] ss:$0 sm:$0xff] }
 0x2eb   :  { %v587_v63 = vmax.f32 %v577_v55, 0.0 }
 0x2ec   :  { %v591_v58 = vadd.f32 %v590_v54, %v584_v50  ;;  %v612_v60 = vadd.f32 %v611_v53, %v605_v51  ;;  %v585_v61 = vmax.f32 %v569_v56, 0.0 }
 0x2ed   :  { %v609_v5 = vmul.f32 %v587_v63, %v587_v63 }
 0x2ee   :  { %v613_v62 = vadd.f32 %v612_v60, %v606_v59  ;;  %v592_v0 = vadd.f32 %v591_v58, %v585_v61  ;;  %v607_v1 = vmul.f32 %v585_v61, %v585_v61 }
 0x2f0   :  { %v593_v3 = vadd.f32 %v592_v0, %v586_v57  ;;  %v614_v4 = vadd.f32 %v613_v62, %v607_v1 }
 0x2f2   :  { %v594_v6 = vadd.f32 %v593_v3, %v587_v63  ;;  %v615_v7 = vadd.f32 %v614_v4, %v608_v2 }
 0x2f4   :  { %v595_v9 = vrot.slane %v594_v6, 4  ;;  %v616_v10 = vadd.f32 %v615_v7, %v609_v5  ;;  %v3630_v7 = vld [vmem:[#allocation8 + $0x48] sm:$0xff]  }
 0x2f6   :  { %v596_v11 = vadd.f32 %v595_v9, %v594_v6  ;;  %v617_v12 = vrot.slane %v616_v10, 4  ;;  %v3629_v6 = vld [vmem:[#allocation8 + $0x50] sm:$0xff]   ;;  %v3631_v9 = vld [vmem:[#allocation8 + $0x40] sm:$0xff]  }
 0x2f7   :  { %3267 = vmatprep.subr.bf16.mxu0 %v3629_v6 }
 0x2f8   :  { %v597_v13 = vrot.slane %v596_v11, 2  ;;  %v618_v14 = vadd.f32 %v617_v12, %v616_v10  ;;  %3268 = vmatpush3.bf16.msra.mxu0 %v3629_v6  ;;  %v3632_v10 = vld [vmem:[#allocation10 + $0x78] sm:$0xff]  }
 0x2f9   :  { %3269 = vmatprep.subr.bf16.mxu0 %v3630_v7  ;;  %v3644_v6 = vld [vmem:[#allocation8 + $0x98] sm:$0xff]  }
 0x2fa   :  { %v598_v15 = vadd.f32 %v597_v13, %v596_v11  ;;  %v619_v17 = vrot.slane %v618_v14, 2  ;;  %v3633_v11 = vld [vmem:[#allocation10 + $0x70] sm:$0xff]  }
 0x2fc   :  { %v599_v19 = vrot.slane %v598_v15, 1  ;;  %v620_v21 = vadd.f32 %v619_v17, %v618_v14  ;;  %3270 = vmatpush3.bf16.msra.mxu0 %v3630_v7 }
 0x2fd   :  { %3271 = vmatprep.subr.bf16.mxu0 %v3631_v9 }
 0x2fe   :  { %v600_v22 = vadd.f32 %v599_v19, %v598_v15  ;;  %v621_v23 = vrot.slane %v620_v21, 1 }
 0x300   :  { %v601_v24 = vmul.f32 0.015625, %v600_v22  ;;  %v622_v25 = vadd.f32 %v621_v23, %v620_v21  ;;  %3272 = vmatpush3.bf16.msra.mxu0 %v3631_v9  ;;  %v2882_v9 = vld [vmem:[%s4413_s6 + $0x1] ss:$0 sm:$0xff] }
 0x302   :  { %v623_v26 = vmul.f32 0.015625, %v622_v25  ;;  %v624_v27 = vmul.f32 %v601_v24, %v601_v24  ;;  %v633_v31 = vsub.f32 %v585_v61, %v601_v24  ;;  %v634_v32 = vsub.f32 %v586_v57, %v601_v24 }
 0x303   :  { %v635_v33 = vsub.f32 %v587_v63, %v601_v24  ;;  %v632_v35 = vsub.f32 %v584_v50, %v601_v24  ;;  %v630_v40 = vsub.f32 %v4107_v37, %v601_v24  ;;  %v631_v41 = vsub.f32 %v4111_v39, %v601_v24 }
 0x304   :  { %v625_v28 = vsub.f32 %v623_v26, %v624_v27  ;;  %v647_v42 = vmul.f32 %v2865_v36, %v633_v31  ;;  %v648_v43 = vmul.f32 %v2865_v36, %v634_v32  ;;  %v628_v51 = vsub.f32 %v4105_v34, %v601_v24 }
 0x305   :  { %v649_v44 = vmul.f32 %v2865_v36, %v635_v33  ;;  %v646_v45 = vmul.f32 %v2865_v36, %v632_v35  ;;  %v644_v48 = vmul.f32 %v2865_v36, %v630_v40  ;;  %v645_v49 = vmul.f32 %v2865_v36, %v631_v41  ;;  %v3638_v40 = vld [vmem:[#allocation10 + $0x48] sm:$0xff]   ;;  %v3639_v41 = vld [vmem:[#allocation10 + $0x40] sm:$0xff]  }
 0x306   :  { %v626_v29 = vmax.f32 %v625_v28, 0.0  ;;  %v629_v52 = vsub.f32 %v4109_v38, %v601_v24  ;;  %v642_v60 = vmul.f32 %v2865_v36, %v628_v51 }
 0x308   :  { %v650_v30 = vadd.f32 1e-05, %v626_v29  ;;  %v643_v61 = vmul.f32 %v2865_v36, %v629_v52  ;;  %v3637_v36 = vld [vmem:[#allocation10 + $0x50] sm:$0xff]  }
 0x30a   :  { %3688 = vrsqrt.f32 %v650_v30 }
 0x317   :  { %v3689_v46 = vpop.eup %3688 }
 0x318   :  { %v658_v53 = vmul.f32 %v3689_v46, %v648_v43  ;;  %v659_v54 = vmul.f32 %v3689_v46, %v649_v44  ;;  %v656_v50 = vmul.f32 %v3689_v46, %v646_v45  ;;  %v657_v55 = vmul.f32 %v3689_v46, %v647_v42  ;;  %v2872_v44 = vld [vmem:[%s4411_s4 + $0x1] ss:$0 sm:$0xff] }
 0x319   :  { %v654_v56 = vmul.f32 %v3689_v46, %v644_v48  ;;  %v655_v37 = vmul.f32 %v3689_v46, %v645_v49  ;;  %v652_v38 = vmul.f32 %v3689_v46, %v642_v60  ;;  %v653_v1 = vmul.f32 %v3689_v46, %v643_v61 }
 0x31a   :  { %v4129_v57 = vadd.f32 %v2866_v47, %v658_v53  ;;  %v4131_v39 = vadd.f32 %v2866_v47, %v659_v54  ;;  %v4133_v58 = vadd.f32 %v2866_v47, %v656_v50  ;;  %v4135_v59 = vadd.f32 %v2866_v47, %v657_v55 }
 0x31b   :  { %v669_v63 = vadd.f32 %v2866_v47, %v654_v56  ;;  %v670_v0 = vadd.f32 %v2866_v47, %v655_v37  ;;  %v667_v3 = vadd.f32 %v2866_v47, %v652_v38  ;;  %v668_v4 = vadd.f32 %v2866_v47, %v653_v1 }
 0x31c   :  { %v678_v34 = vpack.c.bf16 %v4131_v39, %v4129_v57  ;;  %v677_v62 = vpack.c.bf16 %v4135_v59, %v4133_v58 }
 0x31d   :  { %v676_v2 = vpack.c.bf16 %v670_v0, %v669_v63  ;;  %v675_v5 = vpack.c.bf16 %v668_v4, %v667_v3 }
 0x31e   :  { %3241 = vmatprep.subr.bf16.mxu1 %v678_v34 }
 0x31f   :  { %3242 = vmatpush3.bf16.msra.mxu1 %v678_v34 }
 0x320   :  { %3243 = vmatprep.subr.bf16.mxu1 %v677_v62 }
 0x323   :  { %3244 = vmatpush3.bf16.msra.mxu1 %v677_v62 }
 0x324   :  { %3245 = vmatprep.subr.bf16.mxu1 %v676_v2 }
 0x327   :  { %3246 = vmatpush3.bf16.msra.mxu1 %v676_v2  ;;  %v3640_v2 = vld [vmem:[#allocation8 + $0xb8] sm:$0xff]  }
 0x328   :  { %3247 = vmatprep.subr.bf16.mxu1 %v675_v5 }
 0x32b   :  { %3248 = vmatpush3.bf16.msra.mxu1 %v675_v5  ;;  %v3643_v5 = vld [vmem:[#allocation8 + $0xa0] sm:$0xff]  }
 0x32c   :  { %3281 = vmatprep.subr.bf16.mxu1 %v3632_v10 }
 0x32e   :  { %3250 = vmatmul.mubr.msk.bf16.vlgmr.msra.gmra.mxu1 %vm206_vm0, %v4079_v16  ;;  %v3634_v16 = vld [vmem:[#allocation10 + $0x68] sm:$0xff]  }
 0x32f   :  { %3253 = vmatprep.mubr.msk.bf16.mxu1 %vm206_vm0, %v4081_v18  ;;  %3282 = vmatpush3.bf16.msra.mxu1 %v3632_v10  ;;  %v3635_v18 = vld [vmem:[#allocation10 + $0x60] sm:$0xff]  }
 0x330   :  { %3283 = vmatprep.subr.bf16.mxu1 %v3633_v11 }
 0x333   :  { %3284 = vmatpush3.bf16.msra.mxu1 %v3633_v11 }
 0x334   :  { %3285 = vmatprep.subr.bf16.mxu1 %v3634_v16 }
 0x336   :  { %3254 = vmatmul.mubr.msk.bf16.gmra.mxu1 %vm206_vm0, %v4087_v20  ;;  %v3636_v20 = vld [vmem:[#allocation10 + $0x58] sm:$0xff]  }
 0x337   :  { %3286 = vmatpush3.bf16.msra.mxu1 %v3634_v16 }
 0x338   :  { %3287 = vmatprep.subr.bf16.mxu1 %v3635_v18 }
 0x33b   :  { %3288 = vmatpush3.bf16.msra.mxu1 %v3635_v18 }
 0x33c   :  { %3289 = vmatprep.subr.bf16.mxu1 %v3636_v20 }
 0x33f   :  { %3290 = vmatpush3.bf16.msra.mxu1 %v3636_v20 }
 0x340   :  { %3291 = vmatprep.subr.bf16.mxu1 %v3637_v36 }
 0x343   :  { %3292 = vmatpush3.bf16.msra.mxu1 %v3637_v36 }
 0x344   :  { %3293 = vmatprep.subr.bf16.mxu1 %v3638_v40 }
 0x347   :  { %3294 = vmatpush3.bf16.msra.mxu1 %v3638_v40 }
 0x348   :  { %3295 = vmatprep.subr.bf16.mxu1 %v3639_v41 }
 0x34b   :  { %3296 = vmatpush3.bf16.msra.mxu1 %v3639_v41 }
 0x34c   :  { %3321 = vmatprep.subr.bf16.mxu1 %v3640_v2 }
 0x3ee   :  { %v3251_v12 = vpop.f32.mrf.mxu1 }
 0x3ef   :  { %v746_v22 = vadd.f32 %v3251_v12, %v669_v63 }
 0x3f0   :  { %v713_v13 = vpop.f32.mrf.mxu1 }
 0x3f1   :  { %v744_v19 = vadd.f32 %v713_v13, %v667_v3  ;;  %v3641_v3 = vld [vmem:[#allocation8 + $0xb0] sm:$0xff]  }
 0x3f2   :  { %v3252_v14 = vpop.f32.mrf.mxu1 }
 0x3f3   :  { %v747_v15 = vadd.f32 %v3252_v14, %v670_v0 }
 0x3f4   :  { %v716_v17 = vpop.f32.mrf.mxu1 }
 0x3f5   :  { %v745_v21 = vadd.f32 %v716_v17, %v668_v4  ;;  %v753_v25 = vpack.c.bf16 %v747_v15, %v746_v22  ;;  %v3642_v4 = vld [vmem:[#allocation8 + $0xa8] sm:$0xff]  }
 0x3f6   :  { %v3255_v23 = vpop.f32.mrf.mxu1 }
 0x3f7   :  { %v752_v24 = vpack.c.bf16 %v745_v21, %v744_v19  ;;  %v750_v32 = vadd.f32 %v3255_v23, %v4129_v57 }
 0x3f8   :  { %v729_v26 = vpop.f32.mrf.mxu1 }
 0x3f9   :  { %3273 = vmatprep.mubr.bf16.mxu0 %v752_v24  ;;  %v748_v30 = vadd.f32 %v729_v26, %v4133_v58 }
 0x3fa   :  { %v3256_v27 = vpop.f32.mrf.mxu1  ;;  %3274 = vmatmul.mubr.bf16.vlgmr.msra.gmra.mxu0 %v753_v25 }
 0x3fb   :  { %v751_v28 = vadd.f32 %v3256_v27, %v4131_v39 }
 0x3fc   :  { %v732_v29 = vpop.f32.mrf.mxu1 }
 0x3fd   :  { %v749_v31 = vadd.f32 %v732_v29, %v4135_v59  ;;  %v755_v35 = vpack.c.bf16 %v751_v28, %v750_v32 }
 0x3ff   :  { %v754_v33 = vpack.c.bf16 %v749_v31, %v748_v30 }
 0x401   :  { %3277 = vmatprep.mubr.bf16.mxu0 %v754_v33 }
 0x402   :  { %3278 = vmatmul.mubr.bf16.gmra.mxu0 %v755_v35 }
 0x403   :  { %3313 = vmatprep.mubr.msk.bf16.mxu0 %vm206_vm0, %v4073_v8 }
 0x4ba   :  { %v3275_v42 = vpop.f32.mrf.mxu0 }
 0x4bb   :  { %v872_v48 = vadd.f32 %v3275_v42, %v2872_v44 }
 0x4bc   :  { %v863_v43 = vpop.f32.mrf.mxu0 }
 0x4bd   :  { %v864_v46 = vadd.f32 %v2872_v44, %v863_v43  ;;  %v896_v50 = vmax.f32 %v872_v48, 0.0 }
 0x4be   :  { %v3276_v45 = vpop.f32.mrf.mxu0 }
 0x4bf   :  { %v875_v47 = vadd.f32 %v3276_v45, %v2872_v44  ;;  %v894_v53 = vmax.f32 %v864_v46, 0.0 }
 0x4c0   :  { %v866_v8 = vpop.f32.mrf.mxu0 }
 0x4c1   :  { %v867_v49 = vadd.f32 %v2872_v44, %v866_v8  ;;  %v897_v51 = vmax.f32 %v875_v47, 0.0 }
 0x4c2   :  { %v3279_v52 = vpop.f32.mrf.mxu0 }
 0x4c3   :  { %v895_v54 = vmax.f32 %v867_v49, 0.0  ;;  %v903_v37 = vpack.c.bf16 %v897_v51, %v896_v50  ;;  %v888_v59 = vadd.f32 %v3279_v52, %v2872_v44 }
 0x4c4   :  { %v879_v55 = vpop.f32.mrf.mxu0 }
 0x4c5   :  { %v902_v56 = vpack.c.bf16 %v895_v54, %v894_v53  ;;  %v880_v39 = vadd.f32 %v2872_v44, %v879_v55  ;;  %v900_v63 = vmax.f32 %v888_v59, 0.0 }
 0x4c6   :  { %v3280_v57 = vpop.f32.mrf.mxu0 }
 0x4c7   :  { %v891_v58 = vadd.f32 %v3280_v57, %v2872_v44  ;;  %3297 = vmatprep.mubr.bf16.mxu1 %v902_v56  ;;  %v898_v38 = vmax.f32 %v880_v39, 0.0 }
 0x4c8   :  { %v882_v60 = vpop.f32.mrf.mxu0  ;;  %3298 = vmatmul.mubr.bf16.vlgmr.msra.gmra.mxu1 %v903_v37 }
 0x4c9   :  { %v883_v34 = vadd.f32 %v2872_v44, %v882_v60  ;;  %v901_v61 = vmax.f32 %v891_v58, 0.0  ;;  %3322 = vmatpush3.bf16.msra.mxu1 %v3640_v2 }
 0x4ca   :  { %3323 = vmatprep.subr.bf16.mxu1 %v3641_v3 }
 0x4cb   :  { %v899_v62 = vmax.f32 %v883_v34, 0.0  ;;  %v905_v1 = vpack.c.bf16 %v901_v61, %v900_v63 }
 0x4cd   :  { %v904_v0 = vpack.c.bf16 %v899_v62, %v898_v38  ;;  %3324 = vmatpush3.bf16.msra.mxu1 %v3641_v3 }
 0x4ce   :  { %3325 = vmatprep.subr.bf16.mxu1 %v3642_v4 }
 0x4cf   :  { %3301 = vmatprep.mubr.bf16.mxu1 %v904_v0 }
 0x4d0   :  { %3302 = vmatmul.mubr.bf16.gmra.mxu1 %v905_v1 }
 0x4d1   :  { %3326 = vmatpush3.bf16.msra.mxu1 %v3642_v4 }
 0x4d2   :  { %3327 = vmatprep.subr.bf16.mxu1 %v3643_v5 }
 0x4d5   :  { %3328 = vmatpush3.bf16.msra.mxu1 %v3643_v5 }
 0x4d6   :  { %3329 = vmatprep.subr.bf16.mxu1 %v3644_v6 }
 0x4d9   :  { %3330 = vmatpush3.bf16.msra.mxu1 %v3644_v6 }
 0x588   :  { %v3299_v7 = vpop.f32.mrf.mxu1 }
 0x589   :  { %v1022_v18 = vadd.f32 %v3299_v7, %v2882_v9 }
 0x58a   :  { %v1013_v10 = vpop.f32.mrf.mxu1 }
 0x58b   :  { %v1014_v11 = vadd.f32 %v2882_v9, %v1013_v10  ;;  %v4161_v17 = vmax.f32 %v1022_v18, 0.0  ;;  %v2891_v18 = vld [vmem:[#allocation11 + $0x1] ss:$0 sm:$0xff] }
 0x58c   :  { %v3300_v16 = vpop.f32.mrf.mxu1 }
 0x58d   :  { %v1025_v20 = vadd.f32 %v3300_v16, %v2882_v9  ;;  %v4159_v13 = vmax.f32 %v1014_v11, 0.0  ;;  %v1068_v29 = vmul.f32 %v4161_v17, %v4161_v17 }
 0x58e   :  { %v1016_v12 = vpop.f32.mrf.mxu1 }
 0x58f   :  { %v1017_v14 = vadd.f32 %v2882_v9, %v1016_v12  ;;  %v4165_v21 = vmax.f32 %v1025_v20, 0.0  ;;  %v1066_v23 = vmul.f32 %v4159_v13, %v4159_v13 }
 0x590   :  { %v3303_v15 = vpop.f32.mrf.mxu1 }
 0x591   :  { %v4163_v19 = vmax.f32 %v1017_v14, 0.0  ;;  %v1038_v27 = vadd.f32 %v3303_v15, %v2882_v9  ;;  %v1069_v33 = vmul.f32 %v4165_v21, %v4165_v21 }
 0x592   :  { %v1029_v22 = vpop.f32.mrf.mxu1 }
 0x593   :  { %v1052_v24 = vadd.f32 %v4163_v19, %v4159_v13  ;;  %v1067_v25 = vmul.f32 %v4163_v19, %v4163_v19  ;;  %v1030_v26 = vadd.f32 %v2882_v9, %v1029_v22  ;;  %v1050_v43 = vmax.f32 %v1038_v27, 0.0 }
 0x594   :  { %v3304_v28 = vpop.f32.mrf.mxu1 }
 0x595   :  { %v1053_v30 = vadd.f32 %v1052_v24, %v4161_v17  ;;  %v1074_v31 = vadd.f32 %v1067_v25, %v1066_v23  ;;  %v1048_v32 = vmax.f32 %v1030_v26, 0.0  ;;  %v1041_v41 = vadd.f32 %v3304_v28, %v2882_v9  ;;  %v2892_v25 = vld [vmem:[#allocation13 + $0x1] ss:$0 sm:$0xff] }
 0x596   :  { %v1032_v35 = vpop.f32.mrf.mxu1  ;;  %v1072_v52 = vmul.f32 %v1050_v43, %v1050_v43 }
 0x597   :  { %v1075_v36 = vadd.f32 %v1074_v31, %v1068_v29  ;;  %v1054_v40 = vadd.f32 %v1053_v30, %v4165_v21  ;;  %v1033_v42 = vadd.f32 %v2882_v9, %v1032_v35  ;;  %v1070_v45 = vmul.f32 %v1048_v32, %v1048_v32 }
 0x598   :  { %v1051_v8 = vmax.f32 %v1041_v41, 0.0 }
 0x599   :  { %v1055_v44 = vadd.f32 %v1054_v40, %v1048_v32  ;;  %v1076_v46 = vadd.f32 %v1075_v36, %v1069_v33  ;;  %v1049_v47 = vmax.f32 %v1033_v42, 0.0 }
 0x59a   :  { %v1073_v50 = vmul.f32 %v1051_v8, %v1051_v8 }
 0x59b   :  { %v1077_v48 = vadd.f32 %v1076_v46, %v1070_v45  ;;  %v1056_v49 = vadd.f32 %v1055_v44, %v1049_v47  ;;  %v1071_v51 = vmul.f32 %v1049_v47, %v1049_v47 }
 0x59d   :  { %v1057_v53 = vadd.f32 %v1056_v49, %v1050_v43  ;;  %v1078_v54 = vadd.f32 %v1077_v48, %v1071_v51 }
 0x59f   :  { %v1058_v55 = vadd.f32 %v1057_v53, %v1051_v8  ;;  %v1079_v56 = vadd.f32 %v1078_v54, %v1072_v52  ;;  %v4195_v52 = vld [vmem:[#allocation2 + $0x8] sm:$0xff]   ;;  %v4199_v53 = vld [vmem:[#allocation2 + $0x10] sm:$0xff]   ;;  %v4203_v54 = vld [vmem:[#allocation2 + $0x18] sm:$0xff]  }
 0x5a1   :  { %v1059_v37 = vrot.slane %v1058_v55, 4  ;;  %v1080_v57 = vadd.f32 %v1079_v56, %v1073_v50  ;;  %v3645_v50 = vld [vmem:[#allocation8 + $0x90] sm:$0xff]   ;;  %v3647_v56 = vld [vmem:[#allocation8 + $0x80] sm:$0xff]  }
 0x5a2   :  { %3331 = vmatprep.subr.bf16.mxu1 %v3645_v50 }
 0x5a3   :  { %v1060_v39 = vadd.f32 %v1059_v37, %v1058_v55  ;;  %v1081_v58 = vrot.slane %v1080_v57, 4  ;;  %3332 = vmatpush3.bf16.msra.mxu1 %v3645_v50  ;;  %v3646_v55 = vld [vmem:[#allocation8 + $0x88] sm:$0xff]   ;;  %v3648_v37 = vld [vmem:[#allocation10 + $0xb8] sm:$0xff]  }
 0x5a4   :  { %3333 = vmatprep.subr.bf16.mxu1 %v3646_v55  ;;  %v3656_v50 = vld [vmem:[#allocation8 + $0xf8] sm:$0xff]  }
 0x5a5   :  { %v1061_v59 = vrot.slane %v1060_v39, 2  ;;  %v1082_v60 = vadd.f32 %v1081_v58, %v1080_v57  ;;  %v3649_v57 = vld [vmem:[#allocation10 + $0xb0] sm:$0xff]   ;;  %v3651_v58 = vld [vmem:[#allocation10 + $0xa0] sm:$0xff]  }
 0x5a7   :  { %v1062_v34 = vadd.f32 %v1061_v59, %v1060_v39  ;;  %v1083_v61 = vrot.slane %v1082_v60, 2  ;;  %3334 = vmatpush3.bf16.msra.mxu1 %v3646_v55  ;;  %v3650_v39 = vld [vmem:[#allocation10 + $0xa8] sm:$0xff]   ;;  %v3652_v59 = vld [vmem:[#allocation10 + $0x98] sm:$0xff]   ;;  %v3657_v55 = vld [vmem:[#allocation8 + $0xf0] sm:$0xff]  }
 0x5a8   :  { %3335 = vmatprep.subr.bf16.mxu1 %v3647_v56 }
 0x5a9   :  { %v1063_v38 = vrot.slane %v1062_v34, 1  ;;  %v1084_v62 = vadd.f32 %v1083_v61, %v1082_v60 }
 0x5ab   :  { %v1064_v63 = vadd.f32 %v1063_v38, %v1062_v34  ;;  %v1085_v0 = vrot.slane %v1084_v62, 1  ;;  %3336 = vmatpush3.bf16.msra.mxu1 %v3647_v56  ;;  %v3658_v56 = vld [vmem:[#allocation8 + $0xe8] sm:$0xff]  }
 0x5ad   :  { %v1065_v1 = vmul.f32 0.015625, %v1064_v63  ;;  %v1086_v2 = vadd.f32 %v1085_v0, %v1084_v62 }
 0x5af   :  { %v1087_v3 = vmul.f32 0.015625, %v1086_v2  ;;  %v1088_v4 = vmul.f32 %v1065_v1, %v1065_v1  ;;  %v1098_v9 = vsub.f32 %v1049_v47, %v1065_v1  ;;  %v1099_v10 = vsub.f32 %v1050_v43, %v1065_v1 }
 0x5b0   :  { %v1100_v11 = vsub.f32 %v1051_v8, %v1065_v1  ;;  %v1097_v16 = vsub.f32 %v1048_v32, %v1065_v1  ;;  %v1095_v20 = vsub.f32 %v4161_v17, %v1065_v1  ;;  %v1096_v12 = vsub.f32 %v4165_v21, %v1065_v1 }
 0x5b1   :  { %v1089_v5 = vsub.f32 %v1087_v3, %v1088_v4  ;;  %v1112_v14 = vmul.f32 %v2891_v18, %v1098_v9  ;;  %v1113_v15 = vmul.f32 %v2891_v18, %v1099_v10  ;;  %v1093_v28 = vsub.f32 %v4159_v13, %v1065_v1 }
 0x5b2   :  { %v1114_v22 = vmul.f32 %v2891_v18, %v1100_v11  ;;  %v1111_v23 = vmul.f32 %v2891_v18, %v1097_v16  ;;  %v1109_v26 = vmul.f32 %v2891_v18, %v1095_v20  ;;  %v1110_v27 = vmul.f32 %v2891_v18, %v1096_v12  ;;  %v4211_v12 = vld [vmem:[#allocation2] sm:$0xff]  }
 0x5b3   :  { %v1090_v6 = vmax.f32 %v1089_v5, 0.0  ;;  %v1094_v29 = vsub.f32 %v4163_v19, %v1065_v1  ;;  %v1107_v42 = vmul.f32 %v2891_v18, %v1093_v28 }
 0x5b5   :  { %v1115_v7 = vadd.f32 1e-05, %v1090_v6  ;;  %v1108_v43 = vmul.f32 %v2891_v18, %v1094_v29 }
 0x5b7   :  { %3690 = vrsqrt.f32 %v1115_v7 }
 0x5c4   :  { %v3691_v24 = vpop.eup %3690 }
 0x5c5   :  { %v1123_v30 = vmul.f32 %v3691_v24, %v1113_v15  ;;  %v1124_v31 = vmul.f32 %v3691_v24, %v1114_v22  ;;  %v1121_v32 = vmul.f32 %v3691_v24, %v1111_v23  ;;  %v1122_v33 = vmul.f32 %v3691_v24, %v1112_v14  ;;  %v3653_v14 = vld [vmem:[#allocation10 + $0x90] sm:$0xff]   ;;  %v3654_v15 = vld [vmem:[#allocation10 + $0x88] sm:$0xff]   ;;  %v3655_v22 = vld [vmem:[#allocation10 + $0x80] sm:$0xff]  }
 0x5c6   :  { %v1119_v35 = vmul.f32 %v3691_v24, %v1109_v26  ;;  %v1120_v17 = vmul.f32 %v3691_v24, %v1110_v27  ;;  %v1117_v19 = vmul.f32 %v3691_v24, %v1107_v42  ;;  %v1118_v47 = vmul.f32 %v3691_v24, %v1108_v43 }
 0x5c7   :  { %v4183_v36 = vadd.f32 %v2892_v25, %v1123_v30  ;;  %v4185_v21 = vadd.f32 %v2892_v25, %v1124_v31  ;;  %v4187_v40 = vadd.f32 %v2892_v25, %v1121_v32  ;;  %v4189_v41 = vadd.f32 %v2892_v25, %v1122_v33 }
 0x5c8   :  { %v1135_v45 = vadd.f32 %v2892_v25, %v1119_v35  ;;  %v1136_v46 = vadd.f32 %v2892_v25, %v1120_v17  ;;  %v1133_v8 = vadd.f32 %v2892_v25, %v1117_v19  ;;  %v1134_v49 = vadd.f32 %v2892_v25, %v1118_v47  ;;  %v2898_v25 = vld [vmem:[%s4411_s4 + $0x2] ss:$0 sm:$0xff] }
 0x5c9   :  { %v1144_v13 = vpack.c.bf16 %v4185_v21, %v4183_v36  ;;  %v1143_v44 = vpack.c.bf16 %v4189_v41, %v4187_v40 }
 0x5ca   :  { %v1142_v48 = vpack.c.bf16 %v1136_v46, %v1135_v45  ;;  %v1141_v51 = vpack.c.bf16 %v1134_v49, %v1133_v8 }
 0x5cb   :  { %3305 = vmatprep.subr.bf16.mxu0 %v1144_v13 }
 0x5cc   :  { %3306 = vmatpush3.bf16.msra.mxu0 %v1144_v13 }
 0x5cd   :  { %3307 = vmatprep.subr.bf16.mxu0 %v1143_v44 }
 0x5d0   :  { %3308 = vmatpush3.bf16.msra.mxu0 %v1143_v44 }
 0x5d1   :  { %3309 = vmatprep.subr.bf16.mxu0 %v1142_v48 }
 0x5d4   :  { %3310 = vmatpush3.bf16.msra.mxu0 %v1142_v48 }
 0x5d5   :  { %3311 = vmatprep.subr.bf16.mxu0 %v1141_v51 }
 0x5d8   :  { %3312 = vmatpush3.bf16.msra.mxu0 %v1141_v51 }
 0x5d9   :  { %3345 = vmatprep.subr.bf16.mxu0 %v3648_v37 }
 0x5db   :  { %3314 = vmatmul.mubr.msk.bf16.vlgmr.msra.gmra.mxu0 %vm206_vm0, %v4195_v52 }
 0x5dc   :  { %3317 = vmatprep.mubr.msk.bf16.mxu0 %vm206_vm0, %v4199_v53  ;;  %3346 = vmatpush3.bf16.msra.mxu0 %v3648_v37  ;;  %v3659_v37 = vld [vmem:[#allocation8 + $0xe0] sm:$0xff]  }
 0x5dd   :  { %3347 = vmatprep.subr.bf16.mxu0 %v3649_v57 }
 0x5e0   :  { %3348 = vmatpush3.bf16.msra.mxu0 %v3649_v57  ;;  %v3660_v57 = vld [vmem:[#allocation8 + $0xd8] sm:$0xff]  }
 0x5e1   :  { %3349 = vmatprep.subr.bf16.mxu0 %v3650_v39 }
 0x5e3   :  { %3318 = vmatmul.mubr.msk.bf16.gmra.mxu0 %vm206_vm0, %v4203_v54 }
 0x5e4   :  { %3350 = vmatpush3.bf16.msra.mxu0 %v3650_v39 }
 0x5e5   :  { %3351 = vmatprep.subr.bf16.mxu0 %v3651_v58 }
 0x5e8   :  { %3352 = vmatpush3.bf16.msra.mxu0 %v3651_v58  ;;  %v2908_v58 = vld [vmem:[%s4413_s6 + $0x2] ss:$0 sm:$0xff] }
 0x5e9   :  { %3353 = vmatprep.subr.bf16.mxu0 %v3652_v59 }
 0x5ec   :  { %3354 = vmatpush3.bf16.msra.mxu0 %v3652_v59 }
 0x5ed   :  { %3355 = vmatprep.subr.bf16.mxu0 %v3653_v14 }
 0x5f0   :  { %3356 = vmatpush3.bf16.msra.mxu0 %v3653_v14 }
 0x5f1   :  { %3357 = vmatprep.subr.bf16.mxu0 %v3654_v15 }
 0x5f4   :  { %3358 = vmatpush3.bf16.msra.mxu0 %v3654_v15 }
 0x5f5   :  { %3359 = vmatprep.subr.bf16.mxu0 %v3655_v22 }
 0x5f8   :  { %3360 = vmatpush3.bf16.msra.mxu0 %v3655_v22 }
 0x5f9   :  { %3385 = vmatprep.subr.bf16.mxu0 %v3656_v50 }
 0x69b   :  { %v3315_v60 = vpop.f32.mrf.mxu0 }
 0x69c   :  { %v1212_v1 = vadd.f32 %v3315_v60, %v1135_v45 }
 0x69d   :  { %v1179_v34 = vpop.f32.mrf.mxu0 }
 0x69e   :  { %v1210_v63 = vadd.f32 %v1179_v34, %v1133_v8 }
 0x69f   :  { %v3316_v61 = vpop.f32.mrf.mxu0 }
 0x6a0   :  { %v1213_v38 = vadd.f32 %v3316_v61, %v1136_v46 }
 0x6a1   :  { %v1182_v62 = vpop.f32.mrf.mxu0 }
 0x6a2   :  { %v1211_v0 = vadd.f32 %v1182_v62, %v1134_v49  ;;  %v1219_v4 = vpack.c.bf16 %v1213_v38, %v1212_v1 }
 0x6a3   :  { %v3319_v2 = vpop.f32.mrf.mxu0 }
 0x6a4   :  { %v1218_v3 = vpack.c.bf16 %v1211_v0, %v1210_v63  ;;  %v1216_v16 = vadd.f32 %v3319_v2, %v4183_v36 }
 0x6a5   :  { %v1195_v5 = vpop.f32.mrf.mxu0 }
 0x6a6   :  { %3337 = vmatprep.mubr.bf16.mxu1 %v1218_v3  ;;  %v1214_v10 = vadd.f32 %v1195_v5, %v4187_v40 }
 0x6a7   :  { %v3320_v6 = vpop.f32.mrf.mxu0  ;;  %3338 = vmatmul.mubr.bf16.vlgmr.msra.gmra.mxu1 %v1219_v4 }
 0x6a8   :  { %v1217_v7 = vadd.f32 %v3320_v6, %v4185_v21 }
 0x6a9   :  { %v1198_v9 = vpop.f32.mrf.mxu0 }
 0x6aa   :  { %v1215_v11 = vadd.f32 %v1198_v9, %v4189_v41  ;;  %v1221_v20 = vpack.c.bf16 %v1217_v7, %v1216_v16 }
 0x6ac   :  { %v1220_v18 = vpack.c.bf16 %v1215_v11, %v1214_v10 }
 0x6ae   :  { %3341 = vmatprep.mubr.bf16.mxu1 %v1220_v18 }
 0x6af   :  { %3342 = vmatmul.mubr.bf16.gmra.mxu1 %v1221_v20 }
 0x6b0   :  { %3377 = vmatprep.mubr.msk.bf16.mxu1 %vm206_vm0, %v4211_v12 }
 0x767   :  { %v3339_v23 = vpop.f32.mrf.mxu1 }
 0x768   :  { %v1338_v29 = vadd.f32 %v3339_v23, %v2898_v25 }
 0x769   :  { %v1329_v24 = vpop.f32.mrf.mxu1 }
 0x76a   :  { %v1330_v27 = vadd.f32 %v2898_v25, %v1329_v24  ;;  %v1362_v36 = vmax.f32 %v1338_v29, 0.0 }
 0x76b   :  { %v3340_v26 = vpop.f32.mrf.mxu1 }
 0x76c   :  { %v1341_v28 = vadd.f32 %v3340_v26, %v2898_v25  ;;  %v1360_v35 = vmax.f32 %v1330_v27, 0.0 }
 0x76d   :  { %v1332_v30 = vpop.f32.mrf.mxu1 }
 0x76e   :  { %v1333_v31 = vadd.f32 %v2898_v25, %v1332_v30  ;;  %v1363_v32 = vmax.f32 %v1341_v28, 0.0 }
 0x76f   :  { %v3343_v33 = vpop.f32.mrf.mxu1 }
 0x770   :  { %v1361_v17 = vmax.f32 %v1333_v31, 0.0  ;;  %v1369_v41 = vpack.c.bf16 %v1363_v32, %v1362_v36  ;;  %v1354_v19 = vadd.f32 %v3343_v33, %v2898_v25 }
 0x771   :  { %v1345_v21 = vpop.f32.mrf.mxu1 }
 0x772   :  { %v1368_v40 = vpack.c.bf16 %v1361_v17, %v1360_v35  ;;  %v1346_v13 = vadd.f32 %v2898_v25, %v1345_v21  ;;  %v1366_v8 = vmax.f32 %v1354_v19, 0.0 }
 0x773   :  { %v3344_v42 = vpop.f32.mrf.mxu1 }
 0x774   :  { %v1357_v43 = vadd.f32 %v3344_v42, %v2898_v25  ;;  %3361 = vmatprep.mubr.bf16.mxu0 %v1368_v40  ;;  %v1364_v47 = vmax.f32 %v1346_v13, 0.0 }
 0x775   :  { %v1348_v44 = vpop.f32.mrf.mxu1  ;;  %3362 = vmatmul.mubr.bf16.vlgmr.msra.gmra.mxu0 %v1369_v41 }
 0x776   :  { %v1349_v45 = vadd.f32 %v2898_v25, %v1348_v44  ;;  %v1367_v46 = vmax.f32 %v1357_v43, 0.0  ;;  %3386 = vmatpush3.bf16.msra.mxu0 %v3656_v50 }
 0x777   :  { %3387 = vmatprep.subr.bf16.mxu0 %v3657_v55 }
 0x778   :  { %v1365_v48 = vmax.f32 %v1349_v45, 0.0  ;;  %v1371_v51 = vpack.c.bf16 %v1367_v46, %v1366_v8 }
 0x77a   :  { %v1370_v49 = vpack.c.bf16 %v1365_v48, %v1364_v47  ;;  %3388 = vmatpush3.bf16.msra.mxu0 %v3657_v55 }
 0x77b   :  { %3389 = vmatprep.subr.bf16.mxu0 %v3658_v56 }
 0x77c   :  { %3365 = vmatprep.mubr.bf16.mxu0 %v1370_v49 }
 0x77d   :  { %3366 = vmatmul.mubr.bf16.gmra.mxu0 %v1371_v51 }
 0x77e   :  { %3390 = vmatpush3.bf16.msra.mxu0 %v3658_v56 }
 0x77f   :  { %3391 = vmatprep.subr.bf16.mxu0 %v3659_v37 }
 0x782   :  { %3392 = vmatpush3.bf16.msra.mxu0 %v3659_v37 }
 0x783   :  { %3393 = vmatprep.subr.bf16.mxu0 %v3660_v57 }
 0x786   :  { %3394 = vmatpush3.bf16.msra.mxu0 %v3660_v57 }
 0x835   :  { %v3363_v39 = vpop.f32.mrf.mxu0 }
 0x836   :  { %v1488_v61 = vadd.f32 %v3363_v39, %v2908_v58 }
 0x837   :  { %v1479_v59 = vpop.f32.mrf.mxu0 }
 0x838   :  { %v1480_v60 = vadd.f32 %v2908_v58, %v1479_v59  ;;  %v4223_v2 = vmax.f32 %v1488_v61, 0.0 }
 0x839   :  { %v3364_v34 = vpop.f32.mrf.mxu0 }
 0x83a   :  { %v1491_v38 = vadd.f32 %v3364_v34, %v2908_v58  ;;  %v4221_v63 = vmax.f32 %v1480_v60, 0.0  ;;  %v1534_v18 = vmul.f32 %v4223_v2, %v4223_v2 }
 0x83b   :  { %v1482_v62 = vpop.f32.mrf.mxu0 }
 0x83c   :  { %v1483_v0 = vadd.f32 %v2908_v58, %v1482_v62  ;;  %v4227_v4 = vmax.f32 %v1491_v38, 0.0  ;;  %v1532_v6 = vmul.f32 %v4221_v63, %v4221_v63 }
 0x83d   :  { %v3367_v1 = vpop.f32.mrf.mxu0 }
 0x83e   :  { %v4225_v3 = vmax.f32 %v1483_v0, 0.0  ;;  %v1504_v11 = vadd.f32 %v3367_v1, %v2908_v58  ;;  %v1535_v22 = vmul.f32 %v4227_v4, %v4227_v4  ;;  %v2917_v1 = vld [vmem:[#allocation11 + $0x2] ss:$0 sm:$0xff] }
 0x83f   :  { %v1495_v5 = vpop.f32.mrf.mxu0 }
 0x840   :  { %v1518_v7 = vadd.f32 %v4225_v3, %v4221_v63  ;;  %v1533_v9 = vmul.f32 %v4225_v3, %v4225_v3  ;;  %v1496_v10 = vadd.f32 %v2908_v58, %v1495_v5  ;;  %v1516_v28 = vmax.f32 %v1504_v11, 0.0 }
 0x841   :  { %v3368_v16 = vpop.f32.mrf.mxu0 }
 0x842   :  { %v1519_v20 = vadd.f32 %v1518_v7, %v4223_v2  ;;  %v1540_v14 = vadd.f32 %v1533_v9, %v1532_v6  ;;  %v1514_v15 = vmax.f32 %v1496_v10, 0.0  ;;  %v1507_v26 = vadd.f32 %v3368_v16, %v2908_v58 }
 0x843   :  { %v1498_v23 = vpop.f32.mrf.mxu0  ;;  %v1538_v21 = vmul.f32 %v1516_v28, %v1516_v28 }
 0x844   :  { %v1541_v24 = vadd.f32 %v1540_v14, %v1534_v18  ;;  %v1520_v25 = vadd.f32 %v1519_v20, %v4227_v4  ;;  %v1499_v27 = vadd.f32 %v2908_v58, %v1498_v23  ;;  %v1536_v30 = vmul.f32 %v1514_v15, %v1514_v15  ;;  %v2918_v18 = vld [vmem:[#allocation13 + $0x2] ss:$0 sm:$0xff] }
 0x845   :  { %v1517_v35 = vmax.f32 %v1507_v26, 0.0 }
 0x846   :  { %v1521_v29 = vadd.f32 %v1520_v25, %v1514_v15  ;;  %v1542_v31 = vadd.f32 %v1541_v24, %v1535_v22  ;;  %v1515_v32 = vmax.f32 %v1499_v27, 0.0 }
 0x847   :  { %v1539_v42 = vmul.f32 %v1517_v35, %v1517_v35 }
 0x848   :  { %v1543_v33 = vadd.f32 %v1542_v31, %v1536_v30  ;;  %v1522_v17 = vadd.f32 %v1521_v29, %v1515_v32  ;;  %v1537_v36 = vmul.f32 %v1515_v32, %v1515_v32 }
 0x84a   :  { %v1523_v40 = vadd.f32 %v1522_v17, %v1516_v28  ;;  %v1544_v41 = vadd.f32 %v1543_v33, %v1537_v36 }
 0x84c   :  { %v1524_v13 = vadd.f32 %v1523_v40, %v1517_v35  ;;  %v1545_v43 = vadd.f32 %v1544_v41, %v1538_v21 }
 0x84e   :  { %v1525_v19 = vrot.slane %v1524_v13, 4  ;;  %v1546_v44 = vadd.f32 %v1545_v43, %v1539_v42  ;;  %v3662_v43 = vld [vmem:[#allocation8 + $0xc8] sm:$0xff]  }
 0x850   :  { %v1526_v45 = vadd.f32 %v1525_v19, %v1524_v13  ;;  %v1547_v46 = vrot.slane %v1546_v44, 4  ;;  %v3661_v13 = vld [vmem:[#allocation8 + $0xd0] sm:$0xff]   ;;  %v3663_v19 = vld [vmem:[#allocation8 + $0xc0] sm:$0xff]  }
 0x851   :  { %3395 = vmatprep.subr.bf16.mxu0 %v3661_v13 }
 0x852   :  { %v1527_v47 = vrot.slane %v1526_v45, 2  ;;  %v1548_v48 = vadd.f32 %v1547_v46, %v1546_v44  ;;  %3396 = vmatpush3.bf16.msra.mxu0 %v3661_v13  ;;  %v3664_v44 = vld [vmem:[#allocation10 + $0xf8] sm:$0xff]   ;;  %v3666_v46 = vld [vmem:[#allocation10 + $0xe8] sm:$0xff]   ;;  %v3673_v13 = vld [vmem:[#allocation8 + $0x130] sm:$0xff]  }
 0x853   :  { %3397 = vmatprep.subr.bf16.mxu0 %v3662_v43 }
 0x854   :  { %v1528_v8 = vadd.f32 %v1527_v47, %v1526_v45  ;;  %v1549_v49 = vrot.slane %v1548_v48, 2  ;;  %v3665_v45 = vld [vmem:[#allocation10 + $0xf0] sm:$0xff]   ;;  %v3667_v47 = vld [vmem:[#allocation10 + $0xe0] sm:$0xff]  }
 0x856   :  { %v1529_v51 = vrot.slane %v1528_v8, 1  ;;  %v1550_v50 = vadd.f32 %v1549_v49, %v1548_v48  ;;  %3398 = vmatpush3.bf16.msra.mxu0 %v3662_v43  ;;  %v3668_v48 = vld [vmem:[#allocation10 + $0xd8] sm:$0xff]   ;;  %v3674_v43 = vld [vmem:[#allocation8 + $0x128] sm:$0xff]  }
 0x857   :  { %3399 = vmatprep.subr.bf16.mxu0 %v3663_v19 }
 0x858   :  { %v1530_v55 = vadd.f32 %v1529_v51, %v1528_v8  ;;  %v1551_v56 = vrot.slane %v1550_v50, 1 }
 0x85a   :  { %v1531_v37 = vmul.f32 0.015625, %v1530_v55  ;;  %v1552_v57 = vadd.f32 %v1551_v56, %v1550_v50  ;;  %3400 = vmatpush3.bf16.msra.mxu0 %v3663_v19  ;;  %v3675_v19 = vld [vmem:[#allocation8 + $0x120] sm:$0xff]  }
 0x85c   :  { %v1553_v39 = vmul.f32 0.015625, %v1552_v57  ;;  %v1554_v58 = vmul.f32 %v1531_v37, %v1531_v37  ;;  %v1564_v61 = vsub.f32 %v1515_v32, %v1531_v37  ;;  %v1565_v38 = vsub.f32 %v1516_v28, %v1531_v37 }
 0x85d   :  { %v1566_v62 = vsub.f32 %v1517_v35, %v1531_v37  ;;  %v1563_v0 = vsub.f32 %v1514_v15, %v1531_v37  ;;  %v1561_v5 = vsub.f32 %v4223_v2, %v1531_v37  ;;  %v1562_v6 = vsub.f32 %v4227_v4, %v1531_v37 }
 0x85e   :  { %v1555_v59 = vsub.f32 %v1553_v39, %v1554_v58  ;;  %v1578_v7 = vmul.f32 %v2917_v1, %v1564_v61  ;;  %v1579_v9 = vmul.f32 %v2917_v1, %v1565_v38  ;;  %v1559_v22 = vsub.f32 %v4221_v63, %v1531_v37 }
 0x85f   :  { %v1580_v10 = vmul.f32 %v2917_v1, %v1566_v62  ;;  %v1577_v11 = vmul.f32 %v2917_v1, %v1563_v0  ;;  %v1575_v20 = vmul.f32 %v2917_v1, %v1561_v5  ;;  %v1576_v14 = vmul.f32 %v2917_v1, %v1562_v6 }
 0x860   :  { %v1556_v60 = vmax.f32 %v1555_v59, 0.0  ;;  %v1560_v23 = vsub.f32 %v4225_v3, %v1531_v37  ;;  %v1573_v31 = vmul.f32 %v2917_v1, %v1559_v22 }
 0x862   :  { %v1581_v34 = vadd.f32 1e-05, %v1556_v60  ;;  %v1574_v32 = vmul.f32 %v2917_v1, %v1560_v23 }
 0x864   :  { %3692 = vrsqrt.f32 %v1581_v34 }
 0x871   :  { %v3693_v16 = vpop.eup %3692 }
 0x872   :  { %v1589_v24 = vmul.f32 %v3693_v16, %v1579_v9  ;;  %v1590_v25 = vmul.f32 %v3693_v16, %v1580_v10  ;;  %v1587_v15 = vmul.f32 %v3693_v16, %v1577_v11  ;;  %v1588_v26 = vmul.f32 %v3693_v16, %v1578_v7  ;;  %v3669_v7 = vld [vmem:[#allocation10 + $0xd0] sm:$0xff]   ;;  %v3670_v9 = vld [vmem:[#allocation10 + $0xc8] sm:$0xff]   ;;  %v3671_v10 = vld [vmem:[#allocation10 + $0xc0] sm:$0xff]  }
 0x873   :  { %v1585_v27 = vmul.f32 %v3693_v16, %v1575_v20  ;;  %v1586_v2 = vmul.f32 %v3693_v16, %v1576_v14  ;;  %v1583_v3 = vmul.f32 %v3693_v16, %v1573_v31  ;;  %v1584_v36 = vmul.f32 %v3693_v16, %v1574_v32 }
 0x874   :  { %v4245_v28 = vadd.f32 %v2918_v18, %v1589_v24  ;;  %v4247_v4 = vadd.f32 %v2918_v18, %v1590_v25  ;;  %v4249_v29 = vadd.f32 %v2918_v18, %v1587_v15  ;;  %v4251_v30 = vadd.f32 %v2918_v18, %v1588_v26 }
 0x875   :  { %v1601_v35 = vadd.f32 %v2918_v18, %v1585_v27  ;;  %v1602_v17 = vadd.f32 %v2918_v18, %v1586_v2  ;;  %v1599_v40 = vadd.f32 %v2918_v18, %v1583_v3  ;;  %v1600_v41 = vadd.f32 %v2918_v18, %v1584_v36  ;;  %v2924_v18 = vld [vmem:[%s4411_s4 + $0x3] ss:$0 sm:$0xff] }
 0x876   :  { %v1610_v63 = vpack.c.bf16 %v4247_v4, %v4245_v28  ;;  %v1609_v33 = vpack.c.bf16 %v4251_v30, %v4249_v29 }
 0x877   :  { %v1608_v21 = vpack.c.bf16 %v1602_v17, %v1601_v35  ;;  %v1607_v42 = vpack.c.bf16 %v1600_v41, %v1599_v40 }
 0x878   :  { %3369 = vmatprep.subr.bf16.mxu1 %v1610_v63 }
 0x879   :  { %3370 = vmatpush3.bf16.msra.mxu1 %v1610_v63 }
 0x87a   :  { %3371 = vmatprep.subr.bf16.mxu1 %v1609_v33 }
 0x87d   :  { %3372 = vmatpush3.bf16.msra.mxu1 %v1609_v33 }
 0x87e   :  { %3373 = vmatprep.subr.bf16.mxu1 %v1608_v21 }
 0x881   :  { %3374 = vmatpush3.bf16.msra.mxu1 %v1608_v21 }
 0x882   :  { %3375 = vmatprep.subr.bf16.mxu1 %v1607_v42 }
 0x885   :  { %3376 = vmatpush3.bf16.msra.mxu1 %v1607_v42  ;;  %v3672_v42 = vld [vmem:[#allocation8 + $0x138] sm:$0xff]  }
 0x886   :  { %3409 = vmatprep.subr.bf16.mxu1 %v3664_v44 }
 0x888   :  { %3378 = vmatmul.mubr.msk.bf16.vlgmr.msra.gmra.mxu1 %vm206_vm0, %v4195_v52 }
 0x889   :  { %3381 = vmatprep.mubr.msk.bf16.mxu1 %vm206_vm0, %v4199_v53  ;;  %3410 = vmatpush3.bf16.msra.mxu1 %v3664_v44  ;;  %v3676_v44 = vld [vmem:[#allocation8 + $0x118] sm:$0xff]  }
 0x88a   :  { %3411 = vmatprep.subr.bf16.mxu1 %v3665_v45 }
 0x88d   :  { %3412 = vmatpush3.bf16.msra.mxu1 %v3665_v45 }
 0x88e   :  { %3413 = vmatprep.subr.bf16.mxu1 %v3666_v46 }
 0x890   :  { %3382 = vmatmul.mubr.msk.bf16.gmra.mxu1 %vm206_vm0, %v4203_v54 }
 0x891   :  { %3414 = vmatpush3.bf16.msra.mxu1 %v3666_v46  ;;  %v2934_v46 = vld [vmem:[%s4413_s6 + $0x3] ss:$0 sm:$0xff] }
 0x892   :  { %3415 = vmatprep.subr.bf16.mxu1 %v3667_v47 }
 0x895   :  { %3416 = vmatpush3.bf16.msra.mxu1 %v3667_v47 }
 0x896   :  { %3417 = vmatprep.subr.bf16.mxu1 %v3668_v48 }
 0x899   :  { %3418 = vmatpush3.bf16.msra.mxu1 %v3668_v48 }
 0x89a   :  { %3419 = vmatprep.subr.bf16.mxu1 %v3669_v7 }
 0x89d   :  { %3420 = vmatpush3.bf16.msra.mxu1 %v3669_v7 }
 0x89e   :  { %3421 = vmatprep.subr.bf16.mxu1 %v3670_v9 }
 0x8a1   :  { %3422 = vmatpush3.bf16.msra.mxu1 %v3670_v9 }
 0x8a2   :  { %3423 = vmatprep.subr.bf16.mxu1 %v3671_v10 }
 0x8a5   :  { %3424 = vmatpush3.bf16.msra.mxu1 %v3671_v10 }
 0x8a6   :  { %3449 = vmatprep.subr.bf16.mxu1 %v3672_v42 }
 0x948   :  { %v3379_v8 = vpop.f32.mrf.mxu1 }
 0x949   :  { %v1678_v57 = vadd.f32 %v3379_v8, %v1601_v35 }
 0x94a   :  { %v1645_v49 = vpop.f32.mrf.mxu1 }
 0x94b   :  { %v1676_v56 = vadd.f32 %v1645_v49, %v1599_v40 }
 0x94c   :  { %v3380_v51 = vpop.f32.mrf.mxu1 }
 0x94d   :  { %v1679_v50 = vadd.f32 %v3380_v51, %v1602_v17 }
 0x94e   :  { %v1648_v55 = vpop.f32.mrf.mxu1 }
 0x94f   :  { %v1677_v37 = vadd.f32 %v1648_v55, %v1600_v41  ;;  %v1685_v59 = vpack.c.bf16 %v1679_v50, %v1678_v57 }
 0x950   :  { %v3383_v39 = vpop.f32.mrf.mxu1 }
 0x951   :  { %v1684_v58 = vpack.c.bf16 %v1677_v37, %v1676_v56  ;;  %v1682_v1 = vadd.f32 %v3383_v39, %v4245_v28 }
 0x952   :  { %v1661_v60 = vpop.f32.mrf.mxu1 }
 0x953   :  { %3401 = vmatprep.mubr.bf16.mxu0 %v1684_v58  ;;  %v1680_v62 = vadd.f32 %v1661_v60, %v4249_v29 }
 0x954   :  { %v3384_v34 = vpop.f32.mrf.mxu1  ;;  %3402 = vmatmul.mubr.bf16.vlgmr.msra.gmra.mxu0 %v1685_v59 }
 0x955   :  { %v1683_v61 = vadd.f32 %v3384_v34, %v4247_v4 }
 0x956   :  { %v1664_v38 = vpop.f32.mrf.mxu1 }
 0x957   :  { %v1681_v0 = vadd.f32 %v1664_v38, %v4251_v30  ;;  %v1687_v6 = vpack.c.bf16 %v1683_v61, %v1682_v1 }
 0x959   :  { %v1686_v5 = vpack.c.bf16 %v1681_v0, %v1680_v62 }
 0x95b   :  { %3405 = vmatprep.mubr.bf16.mxu0 %v1686_v5 }
 0x95c   :  { %3406 = vmatmul.mubr.bf16.gmra.mxu0 %v1687_v6 }
 0x95d   :  { %3441 = vmatprep.mubr.msk.bf16.mxu0 %vm206_vm0, %v4211_v12 }
 0xa14   :  { %v3403_v11 = vpop.f32.mrf.mxu0 }
 0xa15   :  { %v1804_v23 = vadd.f32 %v3403_v11, %v2924_v18 }
 0xa16   :  { %v1795_v16 = vpop.f32.mrf.mxu0 }
 0xa17   :  { %v1796_v14 = vadd.f32 %v2924_v18, %v1795_v16  ;;  %v1828_v2 = vmax.f32 %v1804_v23, 0.0 }
 0xa18   :  { %v3404_v20 = vpop.f32.mrf.mxu0 }
 0xa19   :  { %v1807_v22 = vadd.f32 %v3404_v20, %v2924_v18  ;;  %v1826_v26 = vmax.f32 %v1796_v14, 0.0 }
 0xa1a   :  { %v1798_v12 = vpop.f32.mrf.mxu0 }
 0xa1b   :  { %v1799_v24 = vadd.f32 %v2924_v18, %v1798_v12  ;;  %v1829_v25 = vmax.f32 %v1807_v22, 0.0 }
 0xa1c   :  { %v3407_v15 = vpop.f32.mrf.mxu0 }
 0xa1d   :  { %v1827_v27 = vmax.f32 %v1799_v24, 0.0  ;;  %v1835_v29 = vpack.c.bf16 %v1829_v25, %v1828_v2  ;;  %v1820_v32 = vadd.f32 %v3407_v15, %v2924_v18 }
 0xa1e   :  { %v1811_v28 = vpop.f32.mrf.mxu0 }
 0xa1f   :  { %v1834_v4 = vpack.c.bf16 %v1827_v27, %v1826_v26  ;;  %v1812_v31 = vadd.f32 %v2924_v18, %v1811_v28  ;;  %v1832_v21 = vmax.f32 %v1820_v32, 0.0 }
 0xa20   :  { %v3408_v30 = vpop.f32.mrf.mxu0 }
 0xa21   :  { %v1823_v63 = vadd.f32 %v3408_v30, %v2924_v18  ;;  %3425 = vmatprep.mubr.bf16.mxu1 %v1834_v4  ;;  %v1830_v17 = vmax.f32 %v1812_v31, 0.0 }
 0xa22   :  { %v1814_v3 = vpop.f32.mrf.mxu0  ;;  %3426 = vmatmul.mubr.bf16.vlgmr.msra.gmra.mxu1 %v1835_v29 }
 0xa23   :  { %v1815_v33 = vadd.f32 %v2924_v18, %v1814_v3  ;;  %v1833_v35 = vmax.f32 %v1823_v63, 0.0  ;;  %3450 = vmatpush3.bf16.msra.mxu1 %v3672_v42 }
 0xa24   :  { %3451 = vmatprep.subr.bf16.mxu1 %v3673_v13 }
 0xa25   :  { %v1831_v36 = vmax.f32 %v1815_v33, 0.0  ;;  %v1837_v41 = vpack.c.bf16 %v1833_v35, %v1832_v21 }
 0xa27   :  { %v1836_v40 = vpack.c.bf16 %v1831_v36, %v1830_v17  ;;  %3452 = vmatpush3.bf16.msra.mxu1 %v3673_v13 }
 0xa28   :  { %3453 = vmatprep.subr.bf16.mxu1 %v3674_v43 }
 0xa29   :  { %3429 = vmatprep.mubr.bf16.mxu1 %v1836_v40 }
 0xa2a   :  { %3430 = vmatmul.mubr.bf16.gmra.mxu1 %v1837_v41 }
 0xa2b   :  { %3454 = vmatpush3.bf16.msra.mxu1 %v3674_v43 }
 0xa2c   :  { %3455 = vmatprep.subr.bf16.mxu1 %v3675_v19 }
 0xa2f   :  { %3456 = vmatpush3.bf16.msra.mxu1 %v3675_v19 }
 0xa30   :  { %3457 = vmatprep.subr.bf16.mxu1 %v3676_v44 }
 0xa33   :  { %3458 = vmatpush3.bf16.msra.mxu1 %v3676_v44 }
 0xae2   :  { %v3427_v45 = vpop.f32.mrf.mxu1 }
 0xae3   :  { %v1954_v49 = vadd.f32 %v3427_v45, %v2934_v46 }
 0xae4   :  { %v1945_v47 = vpop.f32.mrf.mxu1 }
 0xae5   :  { %v1946_v48 = vadd.f32 %v2934_v46, %v1945_v47  ;;  %v4277_v57 = vmax.f32 %v1954_v49, 0.0 }
 0xae6   :  { %v3428_v8 = vpop.f32.mrf.mxu1 }
 0xae7   :  { %v1957_v51 = vadd.f32 %v3428_v8, %v2934_v46  ;;  %v4275_v55 = vmax.f32 %v1946_v48, 0.0  ;;  %v2000_v1 = vmul.f32 %v4277_v57, %v4277_v57 }
 0xae8   :  { %v1948_v50 = vpop.f32.mrf.mxu1 }
 0xae9   :  { %v1949_v56 = vadd.f32 %v2934_v46, %v1948_v50  ;;  %v4281_v58 = vmax.f32 %v1957_v51, 0.0  ;;  %v1998_v60 = vmul.f32 %v4275_v55, %v4275_v55 }
 0xaea   :  { %v3431_v37 = vpop.f32.mrf.mxu1 }
 0xaeb   :  { %v4279_v39 = vmax.f32 %v1949_v56, 0.0  ;;  %v1970_v62 = vadd.f32 %v3431_v37, %v2934_v46  ;;  %v2001_v9 = vmul.f32 %v4281_v58, %v4281_v58  ;;  %v2943_v56 = vld [vmem:[#allocation11 + $0x3] ss:$0 sm:$0xff] }
 0xaec   :  { %v1961_v59 = vpop.f32.mrf.mxu1 }
 0xaed   :  { %v1984_v34 = vadd.f32 %v4279_v39, %v4275_v55  ;;  %v1999_v61 = vmul.f32 %v4279_v39, %v4279_v39  ;;  %v1962_v38 = vadd.f32 %v2934_v46, %v1961_v59  ;;  %v1982_v14 = vmax.f32 %v1970_v62, 0.0 }
 0xaee   :  { %v3432_v0 = vpop.f32.mrf.mxu1 }
 0xaef   :  { %v1985_v5 = vadd.f32 %v1984_v34, %v4277_v57  ;;  %v2006_v6 = vadd.f32 %v1999_v61, %v1998_v60  ;;  %v1980_v7 = vmax.f32 %v1962_v38, 0.0  ;;  %v1973_v18 = vadd.f32 %v3432_v0, %v2934_v46  ;;  %v2944_v0 = vld [vmem:[#allocation13 + $0x3] ss:$0 sm:$0xff] }
 0xaf0   :  { %v1964_v10 = vpop.f32.mrf.mxu1  ;;  %v2004_v2 = vmul.f32 %v1982_v14, %v1982_v14 }
 0xaf1   :  { %v2007_v11 = vadd.f32 %v2006_v6, %v2000_v1  ;;  %v1986_v16 = vadd.f32 %v1985_v5, %v4281_v58  ;;  %v1965_v20 = vadd.f32 %v2934_v46, %v1964_v10  ;;  %v2002_v23 = vmul.f32 %v1980_v7, %v1980_v7 }
 0xaf2   :  { %v1983_v15 = vmax.f32 %v1973_v18, 0.0 }
 0xaf3   :  { %v1987_v22 = vadd.f32 %v1986_v16, %v1980_v7  ;;  %v2008_v12 = vadd.f32 %v2007_v11, %v2001_v9  ;;  %v1981_v24 = vmax.f32 %v1965_v20, 0.0 }
 0xaf4   :  { %v2005_v29 = vmul.f32 %v1983_v15, %v1983_v15 }
 0xaf5   :  { %v2009_v25 = vadd.f32 %v2008_v12, %v2002_v23  ;;  %v1988_v26 = vadd.f32 %v1987_v22, %v1981_v24  ;;  %v2003_v27 = vmul.f32 %v1981_v24, %v1981_v24 }
 0xaf7   :  { %v1989_v28 = vadd.f32 %v1988_v26, %v1982_v14  ;;  %v2010_v4 = vadd.f32 %v2009_v25, %v2003_v27 }
 0xaf9   :  { %v1990_v30 = vadd.f32 %v1989_v28, %v1983_v15  ;;  %v2011_v31 = vadd.f32 %v2010_v4, %v2004_v2 }
 0xafb   :  { %v1991_v63 = vrot.slane %v1990_v30, 4  ;;  %v2012_v32 = vadd.f32 %v2011_v31, %v2005_v29  ;;  %v3677_v29 = vld [vmem:[#allocation8 + $0x110] sm:$0xff]   ;;  %v3679_v31 = vld [vmem:[#allocation8 + $0x100] sm:$0xff]  }
 0xafc   :  { %3459 = vmatprep.subr.bf16.mxu1 %v3677_v29 }
 0xafd   :  { %v1992_v3 = vadd.f32 %v1991_v63, %v1990_v30  ;;  %v2013_v33 = vrot.slane %v2012_v32, 4  ;;  %3460 = vmatpush3.bf16.msra.mxu1 %v3677_v29  ;;  %v3678_v30 = vld [vmem:[#allocation8 + $0x108] sm:$0xff]   ;;  %v3680_v63 = vld [vmem:[#allocation10 + $0x138] sm:$0xff]  }
 0xafe   :  { %3461 = vmatprep.subr.bf16.mxu1 %v3678_v30  ;;  %v2625_v29 = vld [vmem:[#allocation14 + $0x60] sm:$0xff] }
 0xaff   :  { %v1993_v35 = vrot.slane %v1992_v3, 2  ;;  %v2014_v17 = vadd.f32 %v2013_v33, %v2012_v32  ;;  %v3681_v32 = vld [vmem:[#allocation10 + $0x130] sm:$0xff]  }
 0xb01   :  { %v1994_v36 = vadd.f32 %v1993_v35, %v1992_v3  ;;  %v2015_v21 = vrot.slane %v2014_v17, 2  ;;  %3462 = vmatpush3.bf16.msra.mxu1 %v3678_v30  ;;  %v2624_v30 = vld [vmem:[#allocation14 + $0x58] sm:$0xff] }
 0xb02   :  { %3463 = vmatprep.subr.bf16.mxu1 %v3679_v31 }
 0xb03   :  { %v1995_v40 = vrot.slane %v1994_v36, 1  ;;  %v2016_v41 = vadd.f32 %v2015_v21, %v2014_v17 }
 0xb05   :  { %v1996_v42 = vadd.f32 %v1995_v40, %v1994_v36  ;;  %v2017_v13 = vrot.slane %v2016_v41, 1  ;;  %3464 = vmatpush3.bf16.msra.mxu1 %v3679_v31  ;;  %v2623_v31 = vld [vmem:[#allocation14 + $0x50] sm:$0xff] }
 0xb07   :  { %v1997_v43 = vmul.f32 0.015625, %v1996_v42  ;;  %v2018_v19 = vadd.f32 %v2017_v13, %v2016_v41 }
 0xb09   :  { %v2019_v44 = vmul.f32 0.015625, %v2018_v19  ;;  %v2020_v45 = vmul.f32 %v1997_v43, %v1997_v43  ;;  %v2030_v8 = vsub.f32 %v1981_v24, %v1997_v43  ;;  %v2031_v49 = vsub.f32 %v1982_v14, %v1997_v43 }
 0xb0a   :  { %v2032_v51 = vsub.f32 %v1983_v15, %v1997_v43  ;;  %v2029_v50 = vsub.f32 %v1980_v7, %v1997_v43  ;;  %v2027_v37 = vsub.f32 %v4277_v57, %v1997_v43  ;;  %v2028_v59 = vsub.f32 %v4281_v58, %v1997_v43 }
 0xb0b   :  { %v2021_v46 = vsub.f32 %v2019_v44, %v2020_v45  ;;  %v2044_v60 = vmul.f32 %v2943_v56, %v2030_v8  ;;  %v2045_v34 = vmul.f32 %v2943_v56, %v2031_v49  ;;  %v2025_v6 = vsub.f32 %v4275_v55, %v1997_v43 }
 0xb0c   :  { %v2046_v61 = vmul.f32 %v2943_v56, %v2032_v51  ;;  %v2043_v38 = vmul.f32 %v2943_v56, %v2029_v50  ;;  %v2041_v1 = vmul.f32 %v2943_v56, %v2027_v37  ;;  %v2042_v5 = vmul.f32 %v2943_v56, %v2028_v59  ;;  %v3685_v50 = vld [vmem:[#allocation10 + $0x110] sm:$0xff]   ;;  %v3687_v37 = vld [vmem:[#allocation10 + $0x100] sm:$0xff]  }
 0xb0d   :  { %v2022_v47 = vmax.f32 %v2021_v46, 0.0  ;;  %v2026_v9 = vsub.f32 %v4279_v39, %v1997_v43  ;;  %v2039_v23 = vmul.f32 %v2943_v56, %v2025_v6 }
 0xb0f   :  { %v2047_v48 = vadd.f32 1e-05, %v2022_v47  ;;  %v2040_v12 = vmul.f32 %v2943_v56, %v2026_v9  ;;  %v3686_v56 = vld [vmem:[#allocation10 + $0x108] sm:$0xff]  }
 0xb11   :  { %3694 = vrsqrt.f32 %v2047_v48 }
 0xb1e   :  { %v3695_v62 = vpop.eup %3694 }
 0xb1f   :  { %v2055_v10 = vmul.f32 %v3695_v62, %v2045_v34  ;;  %v2056_v11 = vmul.f32 %v3695_v62, %v2046_v61  ;;  %v2053_v7 = vmul.f32 %v3695_v62, %v2043_v38  ;;  %v2054_v16 = vmul.f32 %v3695_v62, %v2044_v60  ;;  %v2950_v34 = vld [vmem:[%s4411_s4 + $0x4] ss:$0 sm:$0xff] }
 0xb20   :  { %v2051_v18 = vmul.f32 %v3695_v62, %v2041_v1  ;;  %v2052_v57 = vmul.f32 %v3695_v62, %v2042_v5  ;;  %v2049_v39 = vmul.f32 %v3695_v62, %v2039_v23  ;;  %v2050_v26 = vmul.f32 %v3695_v62, %v2040_v12 }
 0xb21   :  { %v4299_v20 = vadd.f32 %v2944_v0, %v2055_v10  ;;  %v4301_v58 = vadd.f32 %v2944_v0, %v2056_v11  ;;  %v4303_v14 = vadd.f32 %v2944_v0, %v2053_v7  ;;  %v4305_v22 = vadd.f32 %v2944_v0, %v2054_v16 }
 0xb22   :  { %v2067_v25 = vadd.f32 %v2944_v0, %v2051_v18  ;;  %v2068_v15 = vadd.f32 %v2944_v0, %v2052_v57  ;;  %v2065_v2 = vadd.f32 %v2944_v0, %v2049_v39  ;;  %v2066_v28 = vadd.f32 %v2944_v0, %v2050_v26 }
 0xb23   :  { %v2076_v55 = vpack.c.bf16 %v4301_v58, %v4299_v20  ;;  %v2075_v24 = vpack.c.bf16 %v4305_v22, %v4303_v14 }
 0xb24   :  { %v2074_v27 = vpack.c.bf16 %v2068_v15, %v2067_v25  ;;  %v2073_v4 = vpack.c.bf16 %v2066_v28, %v2065_v2 }
 0xb25   :  { %3433 = vmatprep.subr.bf16.mxu0 %v2076_v55 }
 0xb26   :  { %3434 = vmatpush3.bf16.msra.mxu0 %v2076_v55 }
 0xb27   :  { %3435 = vmatprep.subr.bf16.mxu0 %v2075_v24 }
 0xb2a   :  { %3436 = vmatpush3.bf16.msra.mxu0 %v2075_v24 }
 0xb2b   :  { %3437 = vmatprep.subr.bf16.mxu0 %v2074_v27 }
 0xb2e   :  { %3438 = vmatpush3.bf16.msra.mxu0 %v2074_v27  ;;  %v3933_v27 = vmov 0.0  }
 0xb2f   :  { %3439 = vmatprep.subr.bf16.mxu0 %v2073_v4  ;;  %3497 = vmatprep.subr.mxu1 %v3933_v27 }
 0xb32   :  { %3440 = vmatpush3.bf16.msra.mxu0 %v2073_v4  ;;  %v2626_v4 = vld [vmem:[#allocation14 + $0x68] sm:$0xff] }
 0xb33   :  { %3473 = vmatprep.subr.bf16.mxu0 %v3680_v63 }
 0xb35   :  { %3442 = vmatmul.mubr.msk.bf16.vlgmr.msra.gmra.mxu0 %vm206_vm0, %v4195_v52  ;;  %v3682_v52 = vld [vmem:[#allocation10 + $0x128] sm:$0xff]  }
 0xb36   :  { %3445 = vmatprep.mubr.msk.bf16.mxu0 %vm206_vm0, %v4199_v53  ;;  %3474 = vmatpush3.bf16.msra.mxu0 %v3680_v63  ;;  %v3683_v53 = vld [vmem:[#allocation10 + $0x120] sm:$0xff]   ;;  %v2622_v63 = vld [vmem:[#allocation14 + $0x48] sm:$0xff] }
 0xb37   :  { %3475 = vmatprep.subr.bf16.mxu0 %v3681_v32 }
 0xb3a   :  { %3476 = vmatpush3.bf16.msra.mxu0 %v3681_v32  ;;  %v2621_v32 = vld [vmem:[#allocation14 + $0x40] sm:$0xff] }
 0xb3b   :  { %3477 = vmatprep.subr.bf16.mxu0 %v3682_v52 }
 0xb3d   :  { %3446 = vmatmul.mubr.msk.bf16.gmra.mxu0 %vm206_vm0, %v4203_v54  ;;  %v3684_v54 = vld [vmem:[#allocation10 + $0x118] sm:$0xff]  }
 0xb3e   :  { %3478 = vmatpush3.bf16.msra.mxu0 %v3682_v52  ;;  %v2620_v52 = vld [vmem:[#allocation14 + $0x38] sm:$0xff] }
 0xb3f   :  { %3479 = vmatprep.subr.bf16.mxu0 %v3683_v53 }
 0xb42   :  { %3480 = vmatpush3.bf16.msra.mxu0 %v3683_v53  ;;  %v2619_v53 = vld [vmem:[#allocation14 + $0x30] sm:$0xff] }
 0xb43   :  { %3481 = vmatprep.subr.bf16.mxu0 %v3684_v54 }
 0xb46   :  { %3482 = vmatpush3.bf16.msra.mxu0 %v3684_v54  ;;  %v2618_v54 = vld [vmem:[#allocation14 + $0x28] sm:$0xff] }
 0xb47   :  { %3483 = vmatprep.subr.bf16.mxu0 %v3685_v50 }
 0xb4a   :  { %3484 = vmatpush3.bf16.msra.mxu0 %v3685_v50 }
 0xb4b   :  { %3485 = vmatprep.subr.bf16.mxu0 %v3686_v56 }
 0xb4e   :  { %3486 = vmatpush3.bf16.msra.mxu0 %v3686_v56 }
 0xb4f   :  { %3487 = vmatprep.subr.bf16.mxu0 %v3687_v37 }
 0xb52   :  { %3488 = vmatpush3.bf16.msra.mxu0 %v3687_v37 }
 0xb53   :  { %3516 = vmatprep.subr.mxu0 %v3933_v27 }
 0xbf5   :  { %v3443_v3 = vpop.f32.mrf.mxu0 }
 0xbf6   :  { %v2144_v41 = vadd.f32 %v3443_v3, %v2067_v25  ;;  %v2617_v3 = vld [vmem:[#allocation14 + $0x20] sm:$0xff] }
 0xbf7   :  { %v2111_v33 = vpop.f32.mrf.mxu0 }
 0xbf8   :  { %v2142_v21 = vadd.f32 %v2111_v33, %v2065_v2  ;;  %v2628_v2 = vld [vmem:[#allocation14 + $0x78] sm:$0xff] }
 0xbf9   :  { %v3444_v35 = vpop.f32.mrf.mxu0  ;;  %v2616_v33 = vld [vmem:[#allocation14 + $0x18] sm:$0xff] }
 0xbfa   :  { %v2145_v17 = vadd.f32 %v3444_v35, %v2068_v15  ;;  %v2615_v35 = vld [vmem:[#allocation14 + $0x10] sm:$0xff] }
 0xbfb   :  { %v2114_v36 = vpop.f32.mrf.mxu0 }
 0xbfc   :  { %v2143_v40 = vadd.f32 %v2114_v36, %v2066_v28  ;;  %v2151_v43 = vpack.c.bf16 %v2145_v17, %v2144_v41  ;;  %v2627_v28 = vld [vmem:[#allocation14 + $0x70] sm:$0xff]  ;;  %v2614_v17 = vld [vmem:[#allocation14 + $0x8] sm:$0xff] }
 0xbfd   :  { %v3447_v42 = vpop.f32.mrf.mxu0 }
 0xbfe   :  { %v2150_v13 = vpack.c.bf16 %v2143_v40, %v2142_v21  ;;  %v2148_v8 = vadd.f32 %v3447_v42, %v4299_v20  ;;  %v2960_v21 = vld [vmem:[%s4413_s6 + $0x4] ss:$0 sm:$0xff] }
 0xbff   :  { %v2127_v19 = vpop.f32.mrf.mxu0 }
 0xc00   :  { %3465 = vmatprep.mubr.bf16.mxu1 %v2150_v13  ;;  %v2146_v47 = vadd.f32 %v2127_v19, %v4303_v14 }
 0xc01   :  { %v3448_v44 = vpop.f32.mrf.mxu0  ;;  %3466 = vmatmul.mubr.bf16.vlgmr.msra.gmra.mxu1 %v2151_v43 }
 0xc02   :  { %v2149_v45 = vadd.f32 %v3448_v44, %v4301_v58 }
 0xc03   :  { %v2130_v46 = vpop.f32.mrf.mxu0 }
 0xc04   :  { %v2147_v48 = vadd.f32 %v2130_v46, %v4305_v22  ;;  %v2153_v51 = vpack.c.bf16 %v2149_v45, %v2148_v8 }
 0xc06   :  { %v2152_v49 = vpack.c.bf16 %v2147_v48, %v2146_v47 }
 0xc08   :  { %3469 = vmatprep.mubr.bf16.mxu1 %v2152_v49 }
 0xc09   :  { %3470 = vmatmul.mubr.bf16.gmra.mxu1 %v2153_v51 }
 0xc0a   :  { %3513 = vmatprep.mubr.msk.f32.mxu1 %vm3934_vm1, %v3933_v27 }
 0xcc1   :  { %v3467_v59 = vpop.f32.mrf.mxu1 }
 0xcc2   :  { %v2270_v0 = vadd.f32 %v3467_v59, %v2950_v34 }
 0xcc3   :  { %v2261_v60 = vpop.f32.mrf.mxu1 }
 0xcc4   :  { %v2262_v38 = vadd.f32 %v2950_v34, %v2261_v60  ;;  %v2294_v7 = vmax.f32 %v2270_v0, 0.0 }
 0xcc5   :  { %v3468_v61 = vpop.f32.mrf.mxu1 }
 0xcc6   :  { %v2273_v62 = vadd.f32 %v3468_v61, %v2950_v34  ;;  %v2292_v10 = vmax.f32 %v2262_v38, 0.0 }
 0xcc7   :  { %v2264_v1 = vpop.f32.mrf.mxu1 }
 0xcc8   :  { %v2265_v5 = vadd.f32 %v2950_v34, %v2264_v1  ;;  %v2295_v6 = vmax.f32 %v2273_v62, 0.0 }
 0xcc9   :  { %v3471_v9 = vpop.f32.mrf.mxu1 }
 0xcca   :  { %v2293_v11 = vmax.f32 %v2265_v5, 0.0  ;;  %v2301_v57 = vpack.c.bf16 %v2295_v6, %v2294_v7  ;;  %v2286_v22 = vadd.f32 %v3471_v9, %v2950_v34 }
 0xccb   :  { %v2277_v16 = vpop.f32.mrf.mxu1 }
 0xccc   :  { %v2300_v18 = vpack.c.bf16 %v2293_v11, %v2292_v10  ;;  %v2278_v58 = vadd.f32 %v2950_v34, %v2277_v16  ;;  %v2298_v25 = vmax.f32 %v2286_v22, 0.0 }
 0xccd   :  { %v3472_v20 = vpop.f32.mrf.mxu1 }
 0xcce   :  { %v2289_v14 = vadd.f32 %v3472_v20, %v2950_v34  ;;  %3489 = vmatprep.mubr.bf16.mxu0 %v2300_v18  ;;  %v2296_v39 = vmax.f32 %v2278_v58, 0.0 }
 0xccf   :  { %v2280_v23 = vpop.f32.mrf.mxu1  ;;  %3490 = vmatmul.mubr.bf16.vlgmr.msra.gmra.mxu0 %v2301_v57 }
 0xcd0   :  { %v2281_v55 = vadd.f32 %v2950_v34, %v2280_v23  ;;  %v2299_v12 = vmax.f32 %v2289_v14, 0.0  ;;  %3517 = vmatpush3.msra.mxu0 %v2628_v2 }
 0xcd1   :  { %3518 = vmatprep.subr.mxu0 %v3933_v27 }
 0xcd2   :  { %v2297_v24 = vmax.f32 %v2281_v55, 0.0  ;;  %v2303_v26 = vpack.c.bf16 %v2299_v12, %v2298_v25  ;;  %3519 = vmatpush3.msra.mxu0 %v2627_v28 }
 0xcd3   :  { %3520 = vmatprep.subr.mxu0 %v3933_v27 }
 0xcd4   :  { %v2302_v15 = vpack.c.bf16 %v2297_v24, %v2296_v39  ;;  %3521 = vmatpush3.msra.mxu0 %v2626_v4 }
 0xcd5   :  { %3522 = vmatprep.subr.mxu0 %v3933_v27 }
 0xcd6   :  { %3493 = vmatprep.mubr.bf16.mxu0 %v2302_v15  ;;  %3523 = vmatpush3.msra.mxu0 %v2625_v29 }
 0xcd7   :  { %3494 = vmatmul.mubr.bf16.gmra.mxu0 %v2303_v26  ;;  %3524 = vmatprep.subr.mxu0 %v3933_v27 }
 0xcd8   :  { %3548 = vmatprep.mubr.msk.f32.mxu0 %vm3934_vm1, %v3933_v27  ;;  %3525 = vmatpush3.msra.mxu0 %v2624_v30 }
 0xcd9   :  { %3526 = vmatprep.subr.mxu0 %v3933_v27 }
 0xcda   :  { %3527 = vmatpush3.msra.mxu0 %v2623_v31 }
 0xcdb   :  { %3528 = vmatprep.subr.mxu0 %v3933_v27 }
 0xcdc   :  { %3529 = vmatpush3.msra.mxu0 %v2622_v63 }
 0xcdd   :  { %3530 = vmatprep.subr.mxu0 %v3933_v27 }
 0xcde   :  { %3531 = vmatpush3.msra.mxu0 %v2621_v32 }
 0xcdf   :  { %3532 = vmatprep.subr.mxu0 %v3933_v27 }
 0xce0   :  { %3533 = vmatpush3.msra.mxu0 %v2620_v52 }
 0xce1   :  { %3534 = vmatprep.subr.mxu0 %v3933_v27 }
 0xce2   :  { %3535 = vmatpush3.msra.mxu0 %v2619_v53 }
 0xce3   :  { %3536 = vmatprep.subr.mxu0 %v3933_v27 }
 0xce4   :  { %3537 = vmatpush3.msra.mxu0 %v2618_v54 }
 0xce5   :  { %3538 = vmatprep.subr.mxu0 %v3933_v27 }
 0xce6   :  { %3539 = vmatpush3.msra.mxu0 %v2617_v3 }
 0xce7   :  { %3540 = vmatprep.subr.mxu0 %v3933_v27 }
 0xce8   :  { %3541 = vmatpush3.msra.mxu0 %v2616_v33 }
 0xce9   :  { %3542 = vmatprep.subr.mxu0 %v3933_v27 }
 0xcea   :  { %3543 = vmatpush3.msra.mxu0 %v2615_v35 }
 0xceb   :  { %3544 = vmatprep.subr.mxu0 %v3933_v27 }
 0xcec   :  { %3545 = vmatpush3.msra.mxu0 %v2614_v17 }
 0xced   :  { %3546 = vmatprep.subr.mxu0 %v3933_v27 }
 0xd8f   :  { %v3491_v36 = vpop.f32.mrf.mxu0 }
 0xd90   :  { %v2420_v13 = vadd.f32 %v3491_v36, %v2960_v21 }
 0xd91   :  { %v2411_v40 = vpop.f32.mrf.mxu0 }
 0xd92   :  { %v2412_v41 = vadd.f32 %v2960_v21, %v2411_v40  ;;  %v4350_v47 = vmax.f32 %v2420_v13, 0.0 }
 0xd93   :  { %v3492_v42 = vpop.f32.mrf.mxu0 }
 0xd94   :  { %v2423_v43 = vadd.f32 %v3492_v42, %v2960_v21  ;;  %v4348_v44 = vmax.f32 %v2412_v41, 0.0  ;;  %v2466_v34 = vmul.f32 %v4350_v47, %v4350_v47  ;;  %v2969_v42 = vld [vmem:[#allocation11 + $0x4] ss:$0 sm:$0xff] }
 0xd95   :  { %v2414_v19 = vpop.f32.mrf.mxu0 }
 0xd96   :  { %v2415_v45 = vadd.f32 %v2960_v21, %v2414_v19  ;;  %v4354_v8 = vmax.f32 %v2423_v43, 0.0  ;;  %v2464_v51 = vmul.f32 %v4348_v44, %v4348_v44 }
 0xd97   :  { %v3495_v46 = vpop.f32.mrf.mxu0 }
 0xd98   :  { %v4352_v48 = vmax.f32 %v2415_v45, 0.0  ;;  %v2436_v59 = vadd.f32 %v3495_v46, %v2960_v21  ;;  %v2467_v0 = vmul.f32 %v4354_v8, %v4354_v8 }
 0xd99   :  { %v2427_v49 = vpop.f32.mrf.mxu0 }
 0xd9a   :  { %v2450_v50 = vadd.f32 %v4352_v48, %v4348_v44  ;;  %v2465_v56 = vmul.f32 %v4352_v48, %v4352_v48  ;;  %v2428_v37 = vadd.f32 %v2960_v21, %v2427_v49  ;;  %v2448_v11 = vmax.f32 %v2436_v59, 0.0  ;;  %v2970_v49 = vld [vmem:[#allocation13 + $0x4] ss:$0 sm:$0xff] }
 0xd9b   :  { %v3496_v60 = vpop.f32.mrf.mxu0 }
 0xd9c   :  { %v2451_v61 = vadd.f32 %v2450_v50, %v4350_v47  ;;  %v2472_v38 = vadd.f32 %v2465_v56, %v2464_v51  ;;  %v2446_v62 = vmax.f32 %v2428_v37, 0.0  ;;  %v2439_v9 = vadd.f32 %v3496_v60, %v2960_v21 }
 0xd9d   :  { %v2430_v1 = vpop.f32.mrf.mxu0  ;;  %v2470_v23 = vmul.f32 %v2448_v11, %v2448_v11 }
 0xd9e   :  { %v2473_v5 = vadd.f32 %v2472_v38, %v2466_v34  ;;  %v2452_v6 = vadd.f32 %v2451_v61, %v4354_v8  ;;  %v2431_v10 = vadd.f32 %v2960_v21, %v2430_v1  ;;  %v2468_v16 = vmul.f32 %v2446_v62, %v2446_v62 }
 0xd9f   :  { %v2449_v58 = vmax.f32 %v2439_v9, 0.0 }
 0xda0   :  { %v2453_v7 = vadd.f32 %v2452_v6, %v2446_v62  ;;  %v2474_v18 = vadd.f32 %v2473_v5, %v2467_v0  ;;  %v2447_v57 = vmax.f32 %v2431_v10, 0.0 }
 0xda1   :  { %v2471_v39 = vmul.f32 %v2449_v58, %v2449_v58 }
 0xda2   :  { %v2475_v20 = vadd.f32 %v2474_v18, %v2468_v16  ;;  %v2454_v14 = vadd.f32 %v2453_v7, %v2447_v57  ;;  %v2469_v22 = vmul.f32 %v2447_v57, %v2447_v57 }
 0xda4   :  { %v2455_v55 = vadd.f32 %v2454_v14, %v2448_v11  ;;  %v2476_v12 = vadd.f32 %v2475_v20, %v2469_v22  ;;  %v2613_v14 = vld [vmem:[#allocation14] sm:$0xff]  ;;  %v2722_v22 = vld [vmem:[#allocation16 + $0x78] sm:$0xff] }
 0xda5   :  { %3547 = vmatpush3.msra.mxu0 %v2613_v14 }
 0xda6   :  { %v2456_v24 = vadd.f32 %v2455_v55, %v2449_v58  ;;  %v2477_v25 = vadd.f32 %v2476_v12, %v2470_v23  ;;  %v2721_v23 = vld [vmem:[#allocation16 + $0x70] sm:$0xff]  ;;  %v2720_v55 = vld [vmem:[#allocation16 + $0x68] sm:$0xff]  ;;  %v2719_v12 = vld [vmem:[#allocation16 + $0x60] sm:$0xff] }
 0xda8   :  { %v2457_v15 = vrot.slane %v2456_v24, 4  ;;  %v2478_v26 = vadd.f32 %v2477_v25, %v2471_v39  ;;  %v2718_v39 = vld [vmem:[#allocation16 + $0x58] sm:$0xff]  ;;  %v2716_v25 = vld [vmem:[#allocation16 + $0x48] sm:$0xff] }
 0xdaa   :  { %v2458_v2 = vadd.f32 %v2457_v15, %v2456_v24  ;;  %v2479_v28 = vrot.slane %v2478_v26, 4  ;;  %v2717_v24 = vld [vmem:[#allocation16 + $0x50] sm:$0xff]  ;;  %v2715_v15 = vld [vmem:[#allocation16 + $0x40] sm:$0xff] }
 0xdac   :  { %v2459_v4 = vrot.slane %v2458_v2, 2  ;;  %v2480_v29 = vadd.f32 %v2479_v28, %v2478_v26  ;;  %v2714_v26 = vld [vmem:[#allocation16 + $0x38] sm:$0xff]  ;;  %v2712_v28 = vld [vmem:[#allocation16 + $0x28] sm:$0xff] }
 0xdae   :  { %v2460_v30 = vadd.f32 %v2459_v4, %v2458_v2  ;;  %v2481_v31 = vrot.slane %v2480_v29, 2  ;;  %v2713_v2 = vld [vmem:[#allocation16 + $0x30] sm:$0xff]  ;;  %v2711_v4 = vld [vmem:[#allocation16 + $0x20] sm:$0xff] }
 0xdb0   :  { %v2461_v63 = vrot.slane %v2460_v30, 1  ;;  %v2482_v32 = vadd.f32 %v2481_v31, %v2480_v29  ;;  %v2710_v29 = vld [vmem:[#allocation16 + $0x18] sm:$0xff] }
 0xdb2   :  { %v2462_v52 = vadd.f32 %v2461_v63, %v2460_v30  ;;  %v2483_v53 = vrot.slane %v2482_v32, 1  ;;  %v2709_v63 = vld [vmem:[#allocation16 + $0x10] sm:$0xff] }
 0xdb4   :  { %v2463_v54 = vmul.f32 0.015625, %v2462_v52  ;;  %v2484_v3 = vadd.f32 %v2483_v53, %v2482_v32  ;;  %v2708_v32 = vld [vmem:[#allocation16 + $0x8] sm:$0xff]  ;;  %v2707_v52 = vld [vmem:[#allocation16] sm:$0xff]  ;;  %v2972_v53 = vld [vmem:[%s4417_s10] ss:$0 sm:$0xff]  ;;  %s3935_s10 = smov [#allocation17]  }
 0xdb6   :  { %v2485_v33 = vmul.f32 0.015625, %v2484_v3  ;;  %v2486_v35 = vmul.f32 %v2463_v54, %v2463_v54  ;;  %v2498_v40 = vsub.f32 %v2449_v58, %v2463_v54  ;;  %v2497_v41 = vsub.f32 %v2448_v11, %v2463_v54  ;;  %v2539_v58 = vld [vmem:[#allocation7] sm:$0x3] }
 0xdb7   :  { %v2496_v13 = vsub.f32 %v2447_v57, %v2463_v54  ;;  %v2495_v45 = vsub.f32 %v2446_v62, %v2463_v54  ;;  %v2494_v37 = vsub.f32 %v4354_v8, %v2463_v54  ;;  %v2493_v61 = vsub.f32 %v4350_v47, %v2463_v54 }
 0xdb8   :  { %v2487_v17 = vsub.f32 %v2485_v33, %v2486_v35  ;;  %v2512_v43 = vmul.f32 %v2969_v42, %v2498_v40  ;;  %v2511_v19 = vmul.f32 %v2969_v42, %v2497_v41  ;;  %v2492_v5 = vsub.f32 %v4352_v48, %v2463_v54 }
 0xdb9   :  { %v2510_v51 = vmul.f32 %v2969_v42, %v2496_v13  ;;  %v2509_v34 = vmul.f32 %v2969_v42, %v2495_v45  ;;  %v2508_v1 = vmul.f32 %v2969_v42, %v2494_v37  ;;  %v2507_v9 = vmul.f32 %v2969_v42, %v2493_v61 }
 0xdba   :  { %v2488_v36 = vmax.f32 %v2487_v17, 0.0  ;;  %v2491_v10 = vsub.f32 %v4348_v44, %v2463_v54  ;;  %v2506_v47 = vmul.f32 %v2969_v42, %v2492_v5  ;;  %v2800_v17 = vlaneseq }
 0xdbc   :  { %v2513_v21 = vadd.f32 1e-05, %v2488_v36  ;;  %v2505_v48 = vmul.f32 %v2969_v42, %v2491_v10  ;;  %v2801_v36 = vand.u32 127, %v2800_v17 }
 0xdbe   :  { %3696 = vrsqrt.f32 %v2513_v21  ;;  %v2973_v21 = vld [vmem:[%s4419_s12] ss:$0 sm:$0xff]  ;;  %vm2802_vm2 = vcmp.lt.s32.totalorder %v2801_v36, 1  ;;  %s2826_s12 = sshll.u32 %s3935_s10, 4  ;;  %s2827_s12 = int_to_ptr.vmem [resolvable:$true] %s2826_s12 }
 0xdbf   :  { %s3886_s1 = scalar_lea.vmem %s2827_s12, 32  ;;  %p3891_p4 = scmp.lt.s32.totalorder %s2827_s12, %s2827_s12 }
 0xdc0   :  { %p3887_p3 = scmp.ne.s32.totalorder %s2827_s12, %s3886_s1  ;;  %p3892_p5 = scmp.lt.s32.totalorder %s3886_s1, %s3886_s1 }
 0xdc2   :  { %p3893_p6 = por %p3892_p5, %p3891_p4 }
 0xdc4   :  { %p3894_p7 = pnand %p3893_p6, %p3887_p3 }
 0xdcb   :  { %v3697_v46 = vpop.eup %3696 }
 0xdcc   :  { %v2522_v50 = vmul.f32 %v3697_v46, %v2512_v43  ;;  %v2521_v56 = vmul.f32 %v3697_v46, %v2511_v19  ;;  %v2520_v60 = vmul.f32 %v3697_v46, %v2510_v51  ;;  %v2519_v0 = vmul.f32 %v3697_v46, %v2509_v34 }
 0xdcd   :  { %v2518_v6 = vmul.f32 %v3697_v46, %v2508_v1  ;;  %v2517_v11 = vmul.f32 %v3697_v46, %v2507_v9  ;;  %v2516_v16 = vmul.f32 %v3697_v46, %v2506_v47  ;;  %v2515_v57 = vmul.f32 %v3697_v46, %v2505_v48 }
 0xdce   :  { %v2538_v59 = vadd.f32 %v2970_v49, %v2522_v50  ;;  %v2537_v38 = vadd.f32 %v2970_v49, %v2521_v56  ;;  %v2536_v62 = vadd.f32 %v2970_v49, %v2520_v60  ;;  %v2535_v8 = vadd.f32 %v2970_v49, %v2519_v0 }
 0xdcf   :  { %v2534_v7 = vadd.f32 %v2970_v49, %v2518_v6  ;;  %v2533_v18 = vadd.f32 %v2970_v49, %v2517_v11  ;;  %v2532_v44 = vadd.f32 %v2970_v49, %v2516_v16  ;;  %v2531_v20 = vadd.f32 %v2970_v49, %v2515_v57 }
 0xdd0   :  { %3498 = vmatpush3.msra.mxu1 %v2538_v59 }
 0xdd1   :  { %3499 = vmatprep.subr.mxu1 %v3933_v27 }
 0xdd2   :  { %3500 = vmatpush3.msra.mxu1 %v2537_v38 }
 0xdd3   :  { %3501 = vmatprep.subr.mxu1 %v3933_v27 }
 0xdd4   :  { %3502 = vmatpush3.msra.mxu1 %v2536_v62 }
 0xdd5   :  { %3503 = vmatprep.subr.mxu1 %v3933_v27 }
 0xdd6   :  { %3504 = vmatpush3.msra.mxu1 %v2535_v8 }
 0xdd7   :  { %3505 = vmatprep.subr.mxu1 %v3933_v27 }
 0xdd8   :  { %3506 = vmatpush3.msra.mxu1 %v2534_v7 }
 0xdd9   :  { %3507 = vmatprep.subr.mxu1 %v3933_v27 }
 0xdda   :  { %3508 = vmatpush3.msra.mxu1 %v2533_v18 }
 0xddb   :  { %3509 = vmatprep.subr.mxu1 %v3933_v27 }
 0xddc   :  { %3510 = vmatpush3.msra.mxu1 %v2532_v44 }
 0xddd   :  { %3511 = vmatprep.subr.mxu1 %v3933_v27 }
 0xdde   :  { %3512 = vmatpush3.msra.mxu1 %v2531_v20 }
 0xddf   :  { %3514 = vmatmul.mubr.msk.f32.vlgmr.msra.gmra.mxu1 %vm206_vm0, %v2539_v58  ;;  %3551 = vmatprep.subr.mxu1 %v3933_v27 }
 0xde0   :  { %3583 = vmatprep.mubr.msk.f32.mxu1 %vm3934_vm1, %v3933_v27  ;;  %3552 = vmatpush3.msra.mxu1 %v2722_v22 }
 0xde1   :  { %3553 = vmatprep.subr.mxu1 %v3933_v27 }
 0xde2   :  { %3554 = vmatpush3.msra.mxu1 %v2721_v23 }
 0xde3   :  { %3555 = vmatprep.subr.mxu1 %v3933_v27 }
 0xde4   :  { %3556 = vmatpush3.msra.mxu1 %v2720_v55 }
 0xde5   :  { %3557 = vmatprep.subr.mxu1 %v3933_v27 }
 0xde6   :  { %3558 = vmatpush3.msra.mxu1 %v2719_v12 }
 0xde7   :  { %3559 = vmatprep.subr.mxu1 %v3933_v27 }
 0xde8   :  { %3560 = vmatpush3.msra.mxu1 %v2718_v39 }
 0xde9   :  { %3561 = vmatprep.subr.mxu1 %v3933_v27 }
 0xdea   :  { %3562 = vmatpush3.msra.mxu1 %v2717_v24 }
 0xdeb   :  { %3563 = vmatprep.subr.mxu1 %v3933_v27 }
 0xdec   :  { %3564 = vmatpush3.msra.mxu1 %v2716_v25 }
 0xded   :  { %3565 = vmatprep.subr.mxu1 %v3933_v27 }
 0xdee   :  { %3566 = vmatpush3.msra.mxu1 %v2715_v15 }
 0xdef   :  { %3567 = vmatprep.subr.mxu1 %v3933_v27 }
 0xdf0   :  { %3568 = vmatpush3.msra.mxu1 %v2714_v26 }
 0xdf1   :  { %3569 = vmatprep.subr.mxu1 %v3933_v27 }
 0xdf2   :  { %3570 = vmatpush3.msra.mxu1 %v2713_v2 }
 0xdf3   :  { %3571 = vmatprep.subr.mxu1 %v3933_v27 }
 0xdf4   :  { %3572 = vmatpush3.msra.mxu1 %v2712_v28 }
 0xdf5   :  { %3573 = vmatprep.subr.mxu1 %v3933_v27 }
 0xdf6   :  { %3574 = vmatpush3.msra.mxu1 %v2711_v4 }
 0xdf7   :  { %3575 = vmatprep.subr.mxu1 %v3933_v27 }
 0xdf8   :  { %3576 = vmatpush3.msra.mxu1 %v2710_v29 }
 0xdf9   :  { %3577 = vmatprep.subr.mxu1 %v3933_v27 }
 0xdfa   :  { %3578 = vmatpush3.msra.mxu1 %v2709_v63 }
 0xdfb   :  { %3579 = vmatprep.subr.mxu1 %v3933_v27 }
 0xdfc   :  { %3580 = vmatpush3.msra.mxu1 %v2708_v32 }
 0xdfd   :  { %3581 = vmatprep.subr.mxu1 %v3933_v27 }
 0xdfe   :  { %3582 = vmatpush3.msra.mxu1 %v2707_v52 }
 0xe9f   :  { %v2609_v30 = vpop.f32.mrf.mxu1 }
 0xea0   :  { %3549 = vmatmul.mubr.f32.vlgmr.msra.gmra.mxu0 %v2609_v30 }
 0xea1   :  { %v3515_v31 = vpop.f32.mrf.mxu1 }
 0xf60   :  { %v2702_v54 = vpop.f32.mrf.mxu0 }
 0xf61   :  { %v2703_v3 = vadd.f32 %v2972_v53, %v2702_v54 }
 0xf62   :  { %v3550_v33 = vpop.f32.mrf.mxu0 }
 0xf63   :  { %v2706_v35 = vmax.f32 %v2703_v3, 0.0 }
 0xf65   :  { %3584 = vmatmul.mubr.f32.vlgmr.msra.gmra.mxu1 %v2706_v35 }
0x1025   :  { %v2796_v40 = vpop.f32.mrf.mxu1 }
0x1026   :  { %v2797_v41 = vadd.f32 %v2973_v21, %v2796_v40 }
0x1027   :  { %v3585_v27 = vpop.f32.mrf.mxu1 }
0x1028   :  { %v2803_v42 = vsel %vm2802_vm2, %v2797_v41, -1e+30 }
0x1029   :  { %v2805_v13 = vsel %vm2804_vm3, %v2803_v42, -inf }
0x102a   :  { %2806 = vmax.xlane.f32.xlu0 %v2805_v13 }
0x10b3   :  { %v2807_v43 = vpop.xlane.xlu0 %2806 }
0x10b4   :  { %v2808_v19 = vsub.f32 %v2803_v42, %v2807_v43 }
0x10b6   :  { %v2809_v45 = vmul.f32 1.442695, %v2808_v19 }
0x10b8   :  { %3698 = vpow2.f32 %v2809_v45 }
0x10c5   :  { %v3699_v46 = vpop.eup %3698 }
0x10c6   :  { %v2811_v49 = vsel %vm2802_vm2, %v3699_v46, 0.0 }
0x10c7   :  { %v2812_v51 = vsel %vm2804_vm3, %v2811_v49, 0.0 }
0x10c8   :  { %2813 = vadd.xlane.f32.xlu0 %v2812_v51 }
0x1151   :  { %v2814_v50 = vpop.xlane.xlu0 %2813 }
0x1152   :  { %3700 = vlog2.f32 %v2814_v50 }
0x115f   :  { %v3701_v56 = vpop.eup %3700 }
0x1160   :  { %v2816_v37 = vmul.f32 0.6931472, %v3701_v56 }
0x1162   :  { %v2817_v59 = vadd.f32 %v2816_v37, %v2807_v43 }
0x1164   :  { %v2818_v60 = vsub.f32 %v2803_v42, %v2817_v59 }
0x1166   :  { %2819 = vst [vmem:[#allocation17] sm:$0x3] %v2818_v60 }
0x1167   :  { %3897 = shalt.err (!%p3894_p7)
}
0x1168   :  { %2829 = dma.vmem_to_hbm [thread:$0]  %s2827_s12, 32, %s4420_s13, [#allocation4]  }
0x1169   :  { %3916 = dma.done.wait [#allocation4], 32  }
0x116a   :  { %3917 = vsyncadd [#allocation4], 4294967264 }
0x116b   :  { %2833 = vsyncpa [#allocation3], 1 }
0x116c   :  { %2834 = vsyncpa [#allocation6], 1 }
0x116d   :  { %2835 = vsyncpa [#allocation9], 1 }
0x116e   :  { %2836 = vsyncpa [#allocation12], 1 }
0x116f   :  { %2837 = vsyncpa [#allocation15], 1 }
0x1170   :  { %2838 = vsyncpa [#allocation4], 1 }

</bundles_post_ra>
